<compile_context>
chip_gen: v7x
topology: tpu7x:2x2x1
jax: 0.10.0
libtpu: 0.0.40
codegen_flags: <defaults>
</compile_context>

<pallas_src>
import functools

import jax
import jax.numpy as jnp
from jax.experimental import pallas as pl
from jax.experimental.pallas import tpu as pltpu

_LANE = 128          # vreg lane count
_SUB = 8             # vreg sublane count
_MAX_UNROLL = 16     # max fully-unrolled recurrence steps per kernel call


def _round_up(n, m):
    return (n + m - 1) // m * m


def _cdiv(a, b):
    return (a + b - 1) // b


def _largest_divisor_leq(n, cap):
    for d in range(min(n, cap), 0, -1):
        if n % d == 0:
            return d
    return 1


def _pad2d(a, rows, cols):
    """Zero-pad a 2-D array up to (rows, cols)."""
    return jnp.zeros((rows, cols), a.dtype).at[:a.shape[0], :a.shape[1]].set(a)


def _tpu_kind():
    try:
        return jax.devices()[0].device_kind.lower()
    except Exception:  # pragma: no cover - defensive
        return ""


def _gru_chunk_kernel(x_ref, wih_ref, whh_ref, bi_ref, bhhn_ref,
                      wlin_ref, blin_ref, out_ref, h_ref):
    """One time-chunk of the GRU for one batch tile; h carried in h_ref.

    Shapes (all lane/sublane padded):
      x_ref    : (tc, Bt, Ep)   current time chunk for this batch tile
      wih_ref  : (Ep, 3*Hp)     gates [r|z|n] at 128-aligned lane offsets
      whh_ref  : (Hp, 3*Hp)
      bi_ref   : (1, 3*Hp)      = [b_ih_r+b_hh_r | b_ih_z+b_hh_z | b_ih_n]
      bhhn_ref : (1, Hp)        = b_hh_n (must stay inside the r* product)
      wlin_ref : (Hp, Gp)
      blin_ref : (1, Gp)        (padding lanes hold -1e30 -> vanish in softmax)
      out_ref  : (Bt, Gp)       written only on the last time chunk
      h_ref    : (Bt, Hp) f32   persistent scratch: hidden state carry
    """
    t_idx = pl.program_id(1)
    tc, Bt, Ep = x_ref.shape
    Hp = whh_ref.shape[0]

    # --- New batch tile: reset the carried hidden state. --------------------
    @pl.when(t_idx == 0)
    def _():
        h_ref[...] = jnp.zeros_like(h_ref)

    # --- Hoisted per-chunk input projection: no h dependence, off the -------
    # --- serial path; overlaps with the previous chunk's recurrence via the
    # --- software pipeline on the time grid axis.
    x2 = x_ref[...].reshape(tc * Bt, Ep)
    gi = jnp.dot(x2, wih_ref[...], preferred_element_type=jnp.float32)
    gi = gi + bi_ref[...]                                  # (tc*Bt, 3*Hp) f32

    whh = whh_ref[...]
    bhh_n = bhhn_ref[...]
    mm_dtype = whh.dtype

    # --- Serial recurrence over this chunk, fully unrolled (tc <= 16). ------
    h = h_ref[...]                                         # f32 carry
    for s in range(tc):
        gi_t = gi[s * Bt:(s + 1) * Bt, :]                  # static, aligned
        gh = jnp.dot(h.astype(mm_dtype), whh,
                     preferred_element_type=jnp.float32)   # (Bt, 3*Hp)
        # 128-aligned lane slices: whole-vreg selection, no XLU rotates.
        r = jax.nn.sigmoid(gi_t[:, :Hp] + gh[:, :Hp])
        z = jax.nn.sigmoid(gi_t[:, Hp:2 * Hp] + gh[:, Hp:2 * Hp])
        n = jnp.tanh(gi_t[:, 2 * Hp:] + r * (gh[:, 2 * Hp:] + bhh_n))
        h = (1.0 - z) * n + z * h
    h_ref[...] = h

    # --- Last chunk: classifier head + numerically-stable softmax. ----------
    @pl.when(t_idx == pl.num_programs(1) - 1)
    def _():
        logits = jnp.dot(h.astype(wlin_ref.dtype), wlin_ref[...],
                         preferred_element_type=jnp.float32) + blin_ref[...]
        m = jnp.max(logits, axis=-1, keepdims=True)
        e = jnp.exp(logits - m)
        out_ref[...] = e / jnp.sum(e, axis=-1, keepdims=True)


@functools.partial(jax.jit, static_argnames=("use_bf16_matmul",))
def rnn_classifier_forward(x, w_ih, w_hh, b_ih, b_hh, w_lin, b_lin,
                           use_bf16_matmul=True):
    """x: (T, B, E) float.  Returns softmax probabilities (B, num_genres).

    Parameter layouts follow PyTorch: w_ih (3H, E), w_hh (3H, H), b_* (3H,),
    w_lin (G, H), b_lin (G,); gate order [r, z, n].
    """
    x = x.astype(jnp.float32)                        # matches `x = x.float()`
    T, B, E = x.shape
    H = w_hh.shape[1]
    G = w_lin.shape[0]

    Ep = _round_up(E, _LANE)
    Hp = _round_up(H, _LANE)
    Gp = _round_up(G, _LANE)

    f32 = jnp.float32
    mm_dtype = jnp.bfloat16 if use_bf16_matmul else f32
    mm_bytes = 2 if use_bf16_matmul else 4

    # ---- Chip-aware batch tiling (trace-time query, safe fallback). --------
    kind = _tpu_kind()
    is_v7 = "v7" in kind
    big_mxu = is_v7 or ("v6" in kind)                # 2x256x256 MXU
    max_tile = 256 if big_mxu else 128

    Bp = _round_up(B, _SUB)
    if is_v7 and Bp >= 64:
        # >=2 batch tiles (each >=32 rows) so the "parallel" axis shards the
        # recurrence across both v7x TensorCores.
        b_tile = min(_round_up(_cdiv(Bp, 2), _SUB), max_tile)
    else:
        b_tile = min(Bp, max_tile)
    Bp = _round_up(Bp, b_tile)

    # ---- Time chunking: bound VMEM and the in-kernel unroll. ---------------
    # Budget ~8 MiB for the per-chunk x double-buffer + f32 gi intermediate.
    per_step_bytes = b_tile * (3 * Hp * 4 + 2 * Ep * mm_bytes)
    tc_cap = max(1, min(_MAX_UNROLL, (8 << 20) // max(per_step_bytes, 1)))
    tc = _largest_divisor_leq(T, tc_cap)
    n_tchunks = T // tc

    # ---- Explicit VMEM budget (footprint + headroom, clamped per-chip). ----
    vmem_est = (
        2 * tc * b_tile * Ep * mm_bytes                          # x (2 bufs)
        + 2 * (Ep * 3 * Hp + Hp * 3 * Hp + Hp * Gp) * mm_bytes   # weights
        + 2 * (3 * Hp + Hp + Gp) * 4                             # biases
        + 2 * b_tile * Gp * 4                                    # out (2 bufs)
        + b_tile * Hp * 4                                        # h scratch
        + tc * b_tile * 3 * Hp * 4                               # gi (f32)
        + tc * b_tile * Ep * 4                                   # reshape slack
    )
    vmem_cap = (56 << 20) if is_v7 else (100 << 20)              # v7x: 64 MiB phys
    vmem_limit = int(min(max(2 * vmem_est + (8 << 20), 32 << 20), vmem_cap))

    # ---- Parameter packing (lane/sublane padded, gate-blocked). ------------
    w_ih = w_ih.astype(f32)
    w_hh = w_hh.astype(f32)
    b_ih = b_ih.astype(f32)
    b_hh = b_hh.astype(f32)

    wih_p = jnp.concatenate(
        [_pad2d(w_ih[g * H:(g + 1) * H, :].T, Ep, Hp) for g in range(3)], axis=1)
    whh_p = jnp.concatenate(
        [_pad2d(w_hh[g * H:(g + 1) * H, :].T, Hp, Hp) for g in range(3)], axis=1)

    def pad1(v):
        return jnp.zeros((1, Hp), f32).at[0, :H].set(v)

    # Bias folding: (b_ih + b_hh) merged for r/z; n keeps only b_ih here, its
    # b_hh goes inside the r* product (passed separately).
    bi_p = jnp.concatenate([pad1(b_ih[0:H] + b_hh[0:H]),
                            pad1(b_ih[H:2 * H] + b_hh[H:2 * H]),
                            pad1(b_ih[2 * H:3 * H])], axis=1)      # (1, 3*Hp)
    bhhn_p = pad1(b_hh[2 * H:3 * H])                               # (1, Hp)

    wlin_p = _pad2d(w_lin.astype(f32).T, Hp, Gp)                   # (Hp, Gp)
    blin_p = jnp.full((1, Gp), -1e30, f32).at[0, :G].set(b_lin.astype(f32))

    # Lane/sublane-padded input, time-major.  Matmul operands may be narrowed
    # to bf16 (f32 accumulate in-kernel); biases, the recurrent state h, and
    # all element-wise gate math stay f32.
    xp = jnp.zeros((T, Bp, Ep), f32).at[:, :B, :E].set(x).astype(mm_dtype)
    wih_p = wih_p.astype(mm_dtype)
    whh_p = whh_p.astype(mm_dtype)
    wlin_p = wlin_p.astype(mm_dtype)

    out_padded = pl.pallas_call(
        _gru_chunk_kernel,
        out_shape=jax.ShapeDtypeStruct((Bp, Gp), f32),
        grid=(Bp // b_tile, n_tchunks),
        in_specs=[
            pl.BlockSpec((tc, b_tile, Ep), lambda i, t: (t, i, 0)),   # x chunk
            pl.BlockSpec((Ep, 3 * Hp), lambda i, t: (0, 0)),          # W_ih^T
            pl.BlockSpec((Hp, 3 * Hp), lambda i, t: (0, 0)),          # W_hh^T
            pl.BlockSpec((1, 3 * Hp), lambda i, t: (0, 0)),           # merged bias
            pl.BlockSpec((1, Hp), lambda i, t: (0, 0)),               # b_hh_n
            pl.BlockSpec((Hp, Gp), lambda i, t: (0, 0)),              # W_lin^T
            pl.BlockSpec((1, Gp), lambda i, t: (0, 0)),               # b_lin
        ],
        out_specs=pl.BlockSpec((b_tile, Gp), lambda i, t: (i, 0)),
        scratch_shapes=[pltpu.VMEM((b_tile, Hp), jnp.float32)],       # h carry
        compiler_params=pltpu.CompilerParams(
            # Batch tiles are independent ("parallel", shards across v7x TCs);
            # the time-chunk axis carries h through the scratch ("arbitrary").
            dimension_semantics=("parallel", "arbitrary"),
            vmem_limit_bytes=vmem_limit),
    )(xp, wih_p, whh_p, bi_p, bhhn_p, wlin_p, blin_p)

    return out_padded[:B, :G]


def _reference_forward(x, w_ih, w_hh, b_ih, b_hh, w_lin, b_lin):
    """Pure-JAX reference implementing PyTorch GRU semantics (sanity check)."""
    T, B, E = x.shape
    H = w_hh.shape[1]

    def step(h, x_t):
        gi = x_t @ w_ih.T + b_ih
        gh = h @ w_hh.T + b_hh
        r = jax.nn.sigmoid(gi[:, :H] + gh[:, :H])
        z = jax.nn.sigmoid(gi[:, H:2 * H] + gh[:, H:2 * H])
        n = jnp.tanh(gi[:, 2 * H:] + r * gh[:, 2 * H:])
        h_new = (1.0 - z) * n + z * h
        return h_new, None

    h0 = jnp.zeros((B, H), jnp.float32)
    h_last, _ = jax.lax.scan(step, h0, x.astype(jnp.float32))
    logits = h_last @ w_lin.T + b_lin
    return jax.nn.softmax(logits, axis=-1)


if __name__ == "__main__":
    # Small shapes consistent with the module's forward.
    T, B = 8, 4                 # seq_len, batch
    E, H = 16, 32               # embedding_dim, hidden_dim
    G = 3                       # num_genres

    key = jax.random.PRNGKey(0)
    keys = jax.random.split(key, 8)
    k = 1.0 / jnp.sqrt(H)

    # Deterministic synthetic parameters (PyTorch GRU/Linear shapes).
    w_ih = jax.random.uniform(keys[0], (3 * H, E), jnp.float32, -k, k)
    w_hh = jax.random.uniform(keys[1], (3 * H, H), jnp.float32, -k, k)
    b_ih = jax.random.uniform(keys[2], (3 * H,), jnp.float32, -k, k)
    b_hh = jax.random.uniform(keys[3], (3 * H,), jnp.float32, -k, k)
    w_lin = jax.random.uniform(keys[4], (G, H), jnp.float32, -k, k)
    b_lin = jax.random.uniform(keys[5], (G,), jnp.float32, -k, k)

    x = jax.random.normal(keys[6], (T, B, E), jnp.float32)
    ref = _reference_forward(x, w_ih, w_hh, b_ih, b_hh, w_lin, b_lin)

    # Default path: bf16 MXU operands, f32 state/gates/accumulation.
    out_bf16 = jax.block_until_ready(
        rnn_classifier_forward(x, w_ih, w_hh, b_ih, b_hh, w_lin, b_lin))
    assert out_bf16.shape == (B, G)
    assert jnp.allclose(out_bf16, ref, atol=5e-2, rtol=5e-2)
    assert jnp.allclose(jnp.sum(out_bf16, axis=-1), 1.0, atol=1e-5)

    # Pure-f32 path (tight tolerance).
    out_f32 = jax.block_until_ready(
        rnn_classifier_forward(x, w_ih, w_hh, b_ih, b_hh, w_lin, b_lin,
                               use_bf16_matmul=False))
    assert jnp.allclose(out_f32, ref, atol=1e-5, rtol=1e-5)

    # Exercise the time-chunked carry (T=24 -> 2 chunks of 12) and batch-row
    # padding (B=5 -> padded to 8), f32 path.
    T2, B2 = 24, 5
    x2 = jax.random.normal(keys[7], (T2, B2, E), jnp.float32)
    ref2 = _reference_forward(x2, w_ih, w_hh, b_ih, b_hh, w_lin, b_lin)
    out2 = jax.block_until_ready(
        rnn_classifier_forward(x2, w_ih, w_hh, b_ih, b_hh, w_lin, b_lin,
                               use_bf16_matmul=False))
    assert out2.shape == (B2, G)
    assert jnp.allclose(out2, ref2, atol=1e-4, rtol=1e-4)

    print("KERNEL_OK")
</pallas_src>

<mosaic_0001>
module attributes {stable_mosaic.version = 11 : i64} {
  func.func @_gru_chunk_kernel(%arg0: i32, %arg1: i32, %arg2: memref<8x8x128xbf16, #tpu.memory_space<vmem>>, %arg3: memref<128x384xbf16, #tpu.memory_space<vmem>>, %arg4: memref<128x384xbf16, #tpu.memory_space<vmem>>, %arg5: memref<1x384xf32, #tpu.memory_space<vmem>>, %arg6: memref<1x128xf32, #tpu.memory_space<vmem>>, %arg7: memref<128x128xbf16, #tpu.memory_space<vmem>>, %arg8: memref<1x128xf32, #tpu.memory_space<vmem>>, %arg9: memref<8x128xf32, #tpu.memory_space<vmem>>, %arg10: memref<8x128xf32, #tpu.memory_space<vmem>>) attributes {dimension_semantics = [#tpu.dimension_semantics<parallel>, #tpu.dimension_semantics<arbitrary>], iteration_bounds = array<i64: 1, 1>, scalar_prefetch = 0 : i64, scratch_operands = 1 : i64, tpu.core_type = #tpu.core_type<tc>, window_params = [{transform_indices = @transform_0, window_bounds = array<i64: 8, 8, 128>}, {pipeline_mode = #tpu.pipeline_mode<synchronous>, transform_indices = @transform_1, window_bounds = array<i64: 128, 384>}, {pipeline_mode = #tpu.pipeline_mode<synchronous>, transform_indices = @transform_2, window_bounds = array<i64: 128, 384>}, {pipeline_mode = #tpu.pipeline_mode<synchronous>, transform_indices = @transform_3, window_bounds = array<i64: 1, 384>}, {pipeline_mode = #tpu.pipeline_mode<synchronous>, transform_indices = @transform_4, window_bounds = array<i64: 1, 128>}, {pipeline_mode = #tpu.pipeline_mode<synchronous>, transform_indices = @transform_5, window_bounds = array<i64: 128, 128>}, {pipeline_mode = #tpu.pipeline_mode<synchronous>, transform_indices = @transform_6, window_bounds = array<i64: 1, 128>}, {transform_indices = @transform_7, window_bounds = array<i64: 8, 128>}]} {
    %c0_i32 = arith.constant 0 : i32
    %0 = arith.cmpi eq, %arg1, %c0_i32 : i32
    %1 = arith.extui %0 : i1 to i32
    %c0_i32_0 = arith.constant 0 : i32
    %2 = arith.cmpi ne, %1, %c0_i32_0 : i32
    scf.if %2 {
      %cst_49 = arith.constant 0.000000e+00 : f32
      %265 = vector.broadcast %cst_49 : f32 to vector<8x128xf32>
      %c0_50 = arith.constant 0 : index
      %c0_51 = arith.constant 0 : index
      %266 = vector.load %arg10[%c0_50, %c0_51] : memref<8x128xf32, #tpu.memory_space<vmem>>, vector<8x128xf32>
      tpu.vector_store %arg10[%c0_50, %c0_51], %265 {strides = array<i32>} : memref<8x128xf32, #tpu.memory_space<vmem>>, vector<8x128xf32>,
    } else {
    }
    %c0 = arith.constant 0 : index
    %c0_1 = arith.constant 0 : index
    %c0_2 = arith.constant 0 : index
    %3 = vector.load %arg2[%c0, %c0_1, %c0_2] : memref<8x8x128xbf16, #tpu.memory_space<vmem>>, vector<8x8x128xbf16>
    %4 = vector.shape_cast %3 : vector<8x8x128xbf16> to vector<64x128xbf16>
    %c0_3 = arith.constant 0 : index
    %c0_4 = arith.constant 0 : index
    %5 = vector.load %arg3[%c0_3, %c0_4] : memref<128x384xbf16, #tpu.memory_space<vmem>>, vector<128x384xbf16>
    %cst = arith.constant dense<0.000000e+00> : vector<64x384xf32>
    %6 = tpu.matmul %4, %5, %cst {dimension_numbers = #tpu.dot_dimension_numbers<[1], [0], [0], [1], [0, 0, 1, 1], [], []>} : vector<64x128xbf16>, vector<128x384xbf16>, vector<64x384xf32> -> vector<64x384xf32>
    %c0_5 = arith.constant 0 : index
    %c0_6 = arith.constant 0 : index
    %7 = vector.load %arg5[%c0_5, %c0_6] : memref<1x384xf32, #tpu.memory_space<vmem>>, vector<1x384xf32>
    %8 = vector.broadcast %7 : vector<1x384xf32> to vector<64x384xf32>
    %9 = arith.addf %6, %8 : vector<64x384xf32>
    %c0_7 = arith.constant 0 : index
    %c0_8 = arith.constant 0 : index
    %10 = vector.load %arg4[%c0_7, %c0_8] : memref<128x384xbf16, #tpu.memory_space<vmem>>, vector<128x384xbf16>
    %c0_9 = arith.constant 0 : index
    %c0_10 = arith.constant 0 : index
    %11 = vector.load %arg6[%c0_9, %c0_10] : memref<1x128xf32, #tpu.memory_space<vmem>>, vector<1x128xf32>
    %c0_11 = arith.constant 0 : index
    %c0_12 = arith.constant 0 : index
    %12 = vector.load %arg10[%c0_11, %c0_12] : memref<8x128xf32, #tpu.memory_space<vmem>>, vector<8x128xf32>
    %13 = vector.extract_strided_slice %9 {offsets = [0, 0], sizes = [8, 384], strides = [1, 1]} : vector<64x384xf32> to vector<8x384xf32>
    %14 = arith.truncf %12 : vector<8x128xf32> to vector<8x128xbf16>
    %cst_13 = arith.constant dense<0.000000e+00> : vector<8x384xf32>
    %15 = tpu.matmul %14, %10, %cst_13 {dimension_numbers = #tpu.dot_dimension_numbers<[1], [0], [0], [1], [0, 0, 1, 1], [], []>} : vector<8x128xbf16>, vector<128x384xbf16>, vector<8x384xf32> -> vector<8x384xf32>
    %16 = vector.extract_strided_slice %13 {offsets = [0, 0], sizes = [8, 128], strides = [1, 1]} : vector<8x384xf32> to vector<8x128xf32>
    %17 = vector.extract_strided_slice %15 {offsets = [0, 0], sizes = [8, 128], strides = [1, 1]} : vector<8x384xf32> to vector<8x128xf32>
    %18 = arith.addf %16, %17 : vector<8x128xf32>
    %19 = arith.negf %18 : vector<8x128xf32>
    %20 = math.exp %19 : vector<8x128xf32>
    %cst_14 = arith.constant 1.000000e+00 : f32
    %21 = vector.broadcast %cst_14 : f32 to vector<8x128xf32>
    %22 = arith.addf %21, %20 : vector<8x128xf32>
    %23 = arith.divf %21, %22 : vector<8x128xf32>
    %24 = vector.extract_strided_slice %13 {offsets = [0, 128], sizes = [8, 128], strides = [1, 1]} : vector<8x384xf32> to vector<8x128xf32>
    %25 = vector.extract_strided_slice %15 {offsets = [0, 128], sizes = [8, 128], strides = [1, 1]} : vector<8x384xf32> to vector<8x128xf32>
    %26 = arith.addf %24, %25 : vector<8x128xf32>
    %27 = arith.negf %26 : vector<8x128xf32>
    %28 = math.exp %27 : vector<8x128xf32>
    %cst_15 = arith.constant 1.000000e+00 : f32
    %29 = vector.broadcast %cst_15 : f32 to vector<8x128xf32>
    %30 = arith.addf %29, %28 : vector<8x128xf32>
    %31 = arith.divf %29, %30 : vector<8x128xf32>
    %32 = vector.extract_strided_slice %13 {offsets = [0, 256], sizes = [8, 128], strides = [1, 1]} : vector<8x384xf32> to vector<8x128xf32>
    %33 = vector.extract_strided_slice %15 {offsets = [0, 256], sizes = [8, 128], strides = [1, 1]} : vector<8x384xf32> to vector<8x128xf32>
    %34 = vector.broadcast %11 : vector<1x128xf32> to vector<8x128xf32>
    %35 = arith.addf %33, %34 : vector<8x128xf32>
    %36 = arith.mulf %23, %35 : vector<8x128xf32>
    %37 = arith.addf %32, %36 : vector<8x128xf32>
    %38 = math.tanh %37 : vector<8x128xf32>
    %cst_16 = arith.constant 1.000000e+00 : f32
    %39 = vector.broadcast %cst_16 : f32 to vector<8x128xf32>
    %40 = arith.subf %39, %31 : vector<8x128xf32>
    %41 = arith.mulf %40, %38 : vector<8x128xf32>
    %42 = arith.mulf %31, %12 : vector<8x128xf32>
    %43 = arith.addf %41, %42 : vector<8x128xf32>
    %44 = vector.extract_strided_slice %9 {offsets = [8, 0], sizes = [8, 384], strides = [1, 1]} : vector<64x384xf32> to vector<8x384xf32>
    %45 = arith.truncf %43 : vector<8x128xf32> to vector<8x128xbf16>
    %cst_17 = arith.constant dense<0.000000e+00> : vector<8x384xf32>
    %46 = tpu.matmul %45, %10, %cst_17 {dimension_numbers = #tpu.dot_dimension_numbers<[1], [0], [0], [1], [0, 0, 1, 1], [], []>} : vector<8x128xbf16>, vector<128x384xbf16>, vector<8x384xf32> -> vector<8x384xf32>
    %47 = vector.extract_strided_slice %44 {offsets = [0, 0], sizes = [8, 128], strides = [1, 1]} : vector<8x384xf32> to vector<8x128xf32>
    %48 = vector.extract_strided_slice %46 {offsets = [0, 0], sizes = [8, 128], strides = [1, 1]} : vector<8x384xf32> to vector<8x128xf32>
    %49 = arith.addf %47, %48 : vector<8x128xf32>
    %50 = arith.negf %49 : vector<8x128xf32>
    %51 = math.exp %50 : vector<8x128xf32>
    %cst_18 = arith.constant 1.000000e+00 : f32
    %52 = vector.broadcast %cst_18 : f32 to vector<8x128xf32>
    %53 = arith.addf %52, %51 : vector<8x128xf32>
    %54 = arith.divf %52, %53 : vector<8x128xf32>
    %55 = vector.extract_strided_slice %44 {offsets = [0, 128], sizes = [8, 128], strides = [1, 1]} : vector<8x384xf32> to vector<8x128xf32>
    %56 = vector.extract_strided_slice %46 {offsets = [0, 128], sizes = [8, 128], strides = [1, 1]} : vector<8x384xf32> to vector<8x128xf32>
    %57 = arith.addf %55, %56 : vector<8x128xf32>
    %58 = arith.negf %57 : vector<8x128xf32>
    %59 = math.exp %58 : vector<8x128xf32>
    %cst_19 = arith.constant 1.000000e+00 : f32
    %60 = vector.broadcast %cst_19 : f32 to vector<8x128xf32>
    %61 = arith.addf %60, %59 : vector<8x128xf32>
    %62 = arith.divf %60, %61 : vector<8x128xf32>
    %63 = vector.extract_strided_slice %44 {offsets = [0, 256], sizes = [8, 128], strides = [1, 1]} : vector<8x384xf32> to vector<8x128xf32>
    %64 = vector.extract_strided_slice %46 {offsets = [0, 256], sizes = [8, 128], strides = [1, 1]} : vector<8x384xf32> to vector<8x128xf32>
    %65 = vector.broadcast %11 : vector<1x128xf32> to vector<8x128xf32>
    %66 = arith.addf %64, %65 : vector<8x128xf32>
    %67 = arith.mulf %54, %66 : vector<8x128xf32>
    %68 = arith.addf %63, %67 : vector<8x128xf32>
    %69 = math.tanh %68 : vector<8x128xf32>
    %cst_20 = arith.constant 1.000000e+00 : f32
    %70 = vector.broadcast %cst_20 : f32 to vector<8x128xf32>
    %71 = arith.subf %70, %62 : vector<8x128xf32>
    %72 = arith.mulf %71, %69 : vector<8x128xf32>
    %73 = arith.mulf %62, %43 : vector<8x128xf32>
    %74 = arith.addf %72, %73 : vector<8x128xf32>
    %75 = vector.extract_strided_slice %9 {offsets = [16, 0], sizes = [8, 384], strides = [1, 1]} : vector<64x384xf32> to vector<8x384xf32>
    %76 = arith.truncf %74 : vector<8x128xf32> to vector<8x128xbf16>
    %cst_21 = arith.constant dense<0.000000e+00> : vector<8x384xf32>
    %77 = tpu.matmul %76, %10, %cst_21 {dimension_numbers = #tpu.dot_dimension_numbers<[1], [0], [0], [1], [0, 0, 1, 1], [], []>} : vector<8x128xbf16>, vector<128x384xbf16>, vector<8x384xf32> -> vector<8x384xf32>
    %78 = vector.extract_strided_slice %75 {offsets = [0, 0], sizes = [8, 128], strides = [1, 1]} : vector<8x384xf32> to vector<8x128xf32>
    %79 = vector.extract_strided_slice %77 {offsets = [0, 0], sizes = [8, 128], strides = [1, 1]} : vector<8x384xf32> to vector<8x128xf32>
    %80 = arith.addf %78, %79 : vector<8x128xf32>
    %81 = arith.negf %80 : vector<8x128xf32>
    %82 = math.exp %81 : vector<8x128xf32>
    %cst_22 = arith.constant 1.000000e+00 : f32
    %83 = vector.broadcast %cst_22 : f32 to vector<8x128xf32>
    %84 = arith.addf %83, %82 : vector<8x128xf32>
    %85 = arith.divf %83, %84 : vector<8x128xf32>
    %86 = vector.extract_strided_slice %75 {offsets = [0, 128], sizes = [8, 128], strides = [1, 1]} : vector<8x384xf32> to vector<8x128xf32>
    %87 = vector.extract_strided_slice %77 {offsets = [0, 128], sizes = [8, 128], strides = [1, 1]} : vector<8x384xf32> to vector<8x128xf32>
    %88 = arith.addf %86, %87 : vector<8x128xf32>
    %89 = arith.negf %88 : vector<8x128xf32>
    %90 = math.exp %89 : vector<8x128xf32>
    %cst_23 = arith.constant 1.000000e+00 : f32
    %91 = vector.broadcast %cst_23 : f32 to vector<8x128xf32>
    %92 = arith.addf %91, %90 : vector<8x128xf32>
    %93 = arith.divf %91, %92 : vector<8x128xf32>
    %94 = vector.extract_strided_slice %75 {offsets = [0, 256], sizes = [8, 128], strides = [1, 1]} : vector<8x384xf32> to vector<8x128xf32>
    %95 = vector.extract_strided_slice %77 {offsets = [0, 256], sizes = [8, 128], strides = [1, 1]} : vector<8x384xf32> to vector<8x128xf32>
    %96 = vector.broadcast %11 : vector<1x128xf32> to vector<8x128xf32>
    %97 = arith.addf %95, %96 : vector<8x128xf32>
    %98 = arith.mulf %85, %97 : vector<8x128xf32>
    %99 = arith.addf %94, %98 : vector<8x128xf32>
    %100 = math.tanh %99 : vector<8x128xf32>
    %cst_24 = arith.constant 1.000000e+00 : f32
    %101 = vector.broadcast %cst_24 : f32 to vector<8x128xf32>
    %102 = arith.subf %101, %93 : vector<8x128xf32>
    %103 = arith.mulf %102, %100 : vector<8x128xf32>
    %104 = arith.mulf %93, %74 : vector<8x128xf32>
    %105 = arith.addf %103, %104 : vector<8x128xf32>
    %106 = vector.extract_strided_slice %9 {offsets = [24, 0], sizes = [8, 384], strides = [1, 1]} : vector<64x384xf32> to vector<8x384xf32>
    %107 = arith.truncf %105 : vector<8x128xf32> to vector<8x128xbf16>
    %cst_25 = arith.constant dense<0.000000e+00> : vector<8x384xf32>
    %108 = tpu.matmul %107, %10, %cst_25 {dimension_numbers = #tpu.dot_dimension_numbers<[1], [0], [0], [1], [0, 0, 1, 1], [], []>} : vector<8x128xbf16>, vector<128x384xbf16>, vector<8x384xf32> -> vector<8x384xf32>
    %109 = vector.extract_strided_slice %106 {offsets = [0, 0], sizes = [8, 128], strides = [1, 1]} : vector<8x384xf32> to vector<8x128xf32>
    %110 = vector.extract_strided_slice %108 {offsets = [0, 0], sizes = [8, 128], strides = [1, 1]} : vector<8x384xf32> to vector<8x128xf32>
    %111 = arith.addf %109, %110 : vector<8x128xf32>
    %112 = arith.negf %111 : vector<8x128xf32>
    %113 = math.exp %112 : vector<8x128xf32>
    %cst_26 = arith.constant 1.000000e+00 : f32
    %114 = vector.broadcast %cst_26 : f32 to vector<8x128xf32>
    %115 = arith.addf %114, %113 : vector<8x128xf32>
    %116 = arith.divf %114, %115 : vector<8x128xf32>
    %117 = vector.extract_strided_slice %106 {offsets = [0, 128], sizes = [8, 128], strides = [1, 1]} : vector<8x384xf32> to vector<8x128xf32>
    %118 = vector.extract_strided_slice %108 {offsets = [0, 128], sizes = [8, 128], strides = [1, 1]} : vector<8x384xf32> to vector<8x128xf32>
    %119 = arith.addf %117, %118 : vector<8x128xf32>
    %120 = arith.negf %119 : vector<8x128xf32>
    %121 = math.exp %120 : vector<8x128xf32>
    %cst_27 = arith.constant 1.000000e+00 : f32
    %122 = vector.broadcast %cst_27 : f32 to vector<8x128xf32>
    %123 = arith.addf %122, %121 : vector<8x128xf32>
    %124 = arith.divf %122, %123 : vector<8x128xf32>
    %125 = vector.extract_strided_slice %106 {offsets = [0, 256], sizes = [8, 128], strides = [1, 1]} : vector<8x384xf32> to vector<8x128xf32>
    %126 = vector.extract_strided_slice %108 {offsets = [0, 256], sizes = [8, 128], strides = [1, 1]} : vector<8x384xf32> to vector<8x128xf32>
    %127 = vector.broadcast %11 : vector<1x128xf32> to vector<8x128xf32>
    %128 = arith.addf %126, %127 : vector<8x128xf32>
    %129 = arith.mulf %116, %128 : vector<8x128xf32>
    %130 = arith.addf %125, %129 : vector<8x128xf32>
    %131 = math.tanh %130 : vector<8x128xf32>
    %cst_28 = arith.constant 1.000000e+00 : f32
    %132 = vector.broadcast %cst_28 : f32 to vector<8x128xf32>
    %133 = arith.subf %132, %124 : vector<8x128xf32>
    %134 = arith.mulf %133, %131 : vector<8x128xf32>
    %135 = arith.mulf %124, %105 : vector<8x128xf32>
    %136 = arith.addf %134, %135 : vector<8x128xf32>
    %137 = vector.extract_strided_slice %9 {offsets = [32, 0], sizes = [8, 384], strides = [1, 1]} : vector<64x384xf32> to vector<8x384xf32>
    %138 = arith.truncf %136 : vector<8x128xf32> to vector<8x128xbf16>
    %cst_29 = arith.constant dense<0.000000e+00> : vector<8x384xf32>
    %139 = tpu.matmul %138, %10, %cst_29 {dimension_numbers = #tpu.dot_dimension_numbers<[1], [0], [0], [1], [0, 0, 1, 1], [], []>} : vector<8x128xbf16>, vector<128x384xbf16>, vector<8x384xf32> -> vector<8x384xf32>
    %140 = vector.extract_strided_slice %137 {offsets = [0, 0], sizes = [8, 128], strides = [1, 1]} : vector<8x384xf32> to vector<8x128xf32>
    %141 = vector.extract_strided_slice %139 {offsets = [0, 0], sizes = [8, 128], strides = [1, 1]} : vector<8x384xf32> to vector<8x128xf32>
    %142 = arith.addf %140, %141 : vector<8x128xf32>
    %143 = arith.negf %142 : vector<8x128xf32>
    %144 = math.exp %143 : vector<8x128xf32>
    %cst_30 = arith.constant 1.000000e+00 : f32
    %145 = vector.broadcast %cst_30 : f32 to vector<8x128xf32>
    %146 = arith.addf %145, %144 : vector<8x128xf32>
    %147 = arith.divf %145, %146 : vector<8x128xf32>
    %148 = vector.extract_strided_slice %137 {offsets = [0, 128], sizes = [8, 128], strides = [1, 1]} : vector<8x384xf32> to vector<8x128xf32>
    %149 = vector.extract_strided_slice %139 {offsets = [0, 128], sizes = [8, 128], strides = [1, 1]} : vector<8x384xf32> to vector<8x128xf32>
    %150 = arith.addf %148, %149 : vector<8x128xf32>
    %151 = arith.negf %150 : vector<8x128xf32>
    %152 = math.exp %151 : vector<8x128xf32>
    %cst_31 = arith.constant 1.000000e+00 : f32
    %153 = vector.broadcast %cst_31 : f32 to vector<8x128xf32>
    %154 = arith.addf %153, %152 : vector<8x128xf32>
    %155 = arith.divf %153, %154 : vector<8x128xf32>
    %156 = vector.extract_strided_slice %137 {offsets = [0, 256], sizes = [8, 128], strides = [1, 1]} : vector<8x384xf32> to vector<8x128xf32>
    %157 = vector.extract_strided_slice %139 {offsets = [0, 256], sizes = [8, 128], strides = [1, 1]} : vector<8x384xf32> to vector<8x128xf32>
    %158 = vector.broadcast %11 : vector<1x128xf32> to vector<8x128xf32>
    %159 = arith.addf %157, %158 : vector<8x128xf32>
    %160 = arith.mulf %147, %159 : vector<8x128xf32>
    %161 = arith.addf %156, %160 : vector<8x128xf32>
    %162 = math.tanh %161 : vector<8x128xf32>
    %cst_32 = arith.constant 1.000000e+00 : f32
    %163 = vector.broadcast %cst_32 : f32 to vector<8x128xf32>
    %164 = arith.subf %163, %155 : vector<8x128xf32>
    %165 = arith.mulf %164, %162 : vector<8x128xf32>
    %166 = arith.mulf %155, %136 : vector<8x128xf32>
    %167 = arith.addf %165, %166 : vector<8x128xf32>
    %168 = vector.extract_strided_slice %9 {offsets = [40, 0], sizes = [8, 384], strides = [1, 1]} : vector<64x384xf32> to vector<8x384xf32>
    %169 = arith.truncf %167 : vector<8x128xf32> to vector<8x128xbf16>
    %cst_33 = arith.constant dense<0.000000e+00> : vector<8x384xf32>
    %170 = tpu.matmul %169, %10, %cst_33 {dimension_numbers = #tpu.dot_dimension_numbers<[1], [0], [0], [1], [0, 0, 1, 1], [], []>} : vector<8x128xbf16>, vector<128x384xbf16>, vector<8x384xf32> -> vector<8x384xf32>
    %171 = vector.extract_strided_slice %168 {offsets = [0, 0], sizes = [8, 128], strides = [1, 1]} : vector<8x384xf32> to vector<8x128xf32>
    %172 = vector.extract_strided_slice %170 {offsets = [0, 0], sizes = [8, 128], strides = [1, 1]} : vector<8x384xf32> to vector<8x128xf32>
    %173 = arith.addf %171, %172 : vector<8x128xf32>
    %174 = arith.negf %173 : vector<8x128xf32>
    %175 = math.exp %174 : vector<8x128xf32>
    %cst_34 = arith.constant 1.000000e+00 : f32
    %176 = vector.broadcast %cst_34 : f32 to vector<8x128xf32>
    %177 = arith.addf %176, %175 : vector<8x128xf32>
    %178 = arith.divf %176, %177 : vector<8x128xf32>
    %179 = vector.extract_strided_slice %168 {offsets = [0, 128], sizes = [8, 128], strides = [1, 1]} : vector<8x384xf32> to vector<8x128xf32>
    %180 = vector.extract_strided_slice %170 {offsets = [0, 128], sizes = [8, 128], strides = [1, 1]} : vector<8x384xf32> to vector<8x128xf32>
    %181 = arith.addf %179, %180 : vector<8x128xf32>
    %182 = arith.negf %181 : vector<8x128xf32>
    %183 = math.exp %182 : vector<8x128xf32>
    %cst_35 = arith.constant 1.000000e+00 : f32
    %184 = vector.broadcast %cst_35 : f32 to vector<8x128xf32>
    %185 = arith.addf %184, %183 : vector<8x128xf32>
    %186 = arith.divf %184, %185 : vector<8x128xf32>
    %187 = vector.extract_strided_slice %168 {offsets = [0, 256], sizes = [8, 128], strides = [1, 1]} : vector<8x384xf32> to vector<8x128xf32>
    %188 = vector.extract_strided_slice %170 {offsets = [0, 256], sizes = [8, 128], strides = [1, 1]} : vector<8x384xf32> to vector<8x128xf32>
    %189 = vector.broadcast %11 : vector<1x128xf32> to vector<8x128xf32>
    %190 = arith.addf %188, %189 : vector<8x128xf32>
    %191 = arith.mulf %178, %190 : vector<8x128xf32>
    %192 = arith.addf %187, %191 : vector<8x128xf32>
    %193 = math.tanh %192 : vector<8x128xf32>
    %cst_36 = arith.constant 1.000000e+00 : f32
    %194 = vector.broadcast %cst_36 : f32 to vector<8x128xf32>
    %195 = arith.subf %194, %186 : vector<8x128xf32>
    %196 = arith.mulf %195, %193 : vector<8x128xf32>
    %197 = arith.mulf %186, %167 : vector<8x128xf32>
    %198 = arith.addf %196, %197 : vector<8x128xf32>
    %199 = vector.extract_strided_slice %9 {offsets = [48, 0], sizes = [8, 384], strides = [1, 1]} : vector<64x384xf32> to vector<8x384xf32>
    %200 = arith.truncf %198 : vector<8x128xf32> to vector<8x128xbf16>
    %cst_37 = arith.constant dense<0.000000e+00> : vector<8x384xf32>
    %201 = tpu.matmul %200, %10, %cst_37 {dimension_numbers = #tpu.dot_dimension_numbers<[1], [0], [0], [1], [0, 0, 1, 1], [], []>} : vector<8x128xbf16>, vector<128x384xbf16>, vector<8x384xf32> -> vector<8x384xf32>
    %202 = vector.extract_strided_slice %199 {offsets = [0, 0], sizes = [8, 128], strides = [1, 1]} : vector<8x384xf32> to vector<8x128xf32>
    %203 = vector.extract_strided_slice %201 {offsets = [0, 0], sizes = [8, 128], strides = [1, 1]} : vector<8x384xf32> to vector<8x128xf32>
    %204 = arith.addf %202, %203 : vector<8x128xf32>
    %205 = arith.negf %204 : vector<8x128xf32>
    %206 = math.exp %205 : vector<8x128xf32>
    %cst_38 = arith.constant 1.000000e+00 : f32
    %207 = vector.broadcast %cst_38 : f32 to vector<8x128xf32>
    %208 = arith.addf %207, %206 : vector<8x128xf32>
    %209 = arith.divf %207, %208 : vector<8x128xf32>
    %210 = vector.extract_strided_slice %199 {offsets = [0, 128], sizes = [8, 128], strides = [1, 1]} : vector<8x384xf32> to vector<8x128xf32>
    %211 = vector.extract_strided_slice %201 {offsets = [0, 128], sizes = [8, 128], strides = [1, 1]} : vector<8x384xf32> to vector<8x128xf32>
    %212 = arith.addf %210, %211 : vector<8x128xf32>
    %213 = arith.negf %212 : vector<8x128xf32>
    %214 = math.exp %213 : vector<8x128xf32>
    %cst_39 = arith.constant 1.000000e+00 : f32
    %215 = vector.broadcast %cst_39 : f32 to vector<8x128xf32>
    %216 = arith.addf %215, %214 : vector<8x128xf32>
    %217 = arith.divf %215, %216 : vector<8x128xf32>
    %218 = vector.extract_strided_slice %199 {offsets = [0, 256], sizes = [8, 128], strides = [1, 1]} : vector<8x384xf32> to vector<8x128xf32>
    %219 = vector.extract_strided_slice %201 {offsets = [0, 256], sizes = [8, 128], strides = [1, 1]} : vector<8x384xf32> to vector<8x128xf32>
    %220 = vector.broadcast %11 : vector<1x128xf32> to vector<8x128xf32>
    %221 = arith.addf %219, %220 : vector<8x128xf32>
    %222 = arith.mulf %209, %221 : vector<8x128xf32>
    %223 = arith.addf %218, %222 : vector<8x128xf32>
    %224 = math.tanh %223 : vector<8x128xf32>
    %cst_40 = arith.constant 1.000000e+00 : f32
    %225 = vector.broadcast %cst_40 : f32 to vector<8x128xf32>
    %226 = arith.subf %225, %217 : vector<8x128xf32>
    %227 = arith.mulf %226, %224 : vector<8x128xf32>
    %228 = arith.mulf %217, %198 : vector<8x128xf32>
    %229 = arith.addf %227, %228 : vector<8x128xf32>
    %230 = vector.extract_strided_slice %9 {offsets = [56, 0], sizes = [8, 384], strides = [1, 1]} : vector<64x384xf32> to vector<8x384xf32>
    %231 = arith.truncf %229 : vector<8x128xf32> to vector<8x128xbf16>
    %cst_41 = arith.constant dense<0.000000e+00> : vector<8x384xf32>
    %232 = tpu.matmul %231, %10, %cst_41 {dimension_numbers = #tpu.dot_dimension_numbers<[1], [0], [0], [1], [0, 0, 1, 1], [], []>} : vector<8x128xbf16>, vector<128x384xbf16>, vector<8x384xf32> -> vector<8x384xf32>
    %233 = vector.extract_strided_slice %230 {offsets = [0, 0], sizes = [8, 128], strides = [1, 1]} : vector<8x384xf32> to vector<8x128xf32>
    %234 = vector.extract_strided_slice %232 {offsets = [0, 0], sizes = [8, 128], strides = [1, 1]} : vector<8x384xf32> to vector<8x128xf32>
    %235 = arith.addf %233, %234 : vector<8x128xf32>
    %236 = arith.negf %235 : vector<8x128xf32>
    %237 = math.exp %236 : vector<8x128xf32>
    %cst_42 = arith.constant 1.000000e+00 : f32
    %238 = vector.broadcast %cst_42 : f32 to vector<8x128xf32>
    %239 = arith.addf %238, %237 : vector<8x128xf32>
    %240 = arith.divf %238, %239 : vector<8x128xf32>
    %241 = vector.extract_strided_slice %230 {offsets = [0, 128], sizes = [8, 128], strides = [1, 1]} : vector<8x384xf32> to vector<8x128xf32>
    %242 = vector.extract_strided_slice %232 {offsets = [0, 128], sizes = [8, 128], strides = [1, 1]} : vector<8x384xf32> to vector<8x128xf32>
    %243 = arith.addf %241, %242 : vector<8x128xf32>
    %244 = arith.negf %243 : vector<8x128xf32>
    %245 = math.exp %244 : vector<8x128xf32>
    %cst_43 = arith.constant 1.000000e+00 : f32
    %246 = vector.broadcast %cst_43 : f32 to vector<8x128xf32>
    %247 = arith.addf %246, %245 : vector<8x128xf32>
    %248 = arith.divf %246, %247 : vector<8x128xf32>
    %249 = vector.extract_strided_slice %230 {offsets = [0, 256], sizes = [8, 128], strides = [1, 1]} : vector<8x384xf32> to vector<8x128xf32>
    %250 = vector.extract_strided_slice %232 {offsets = [0, 256], sizes = [8, 128], strides = [1, 1]} : vector<8x384xf32> to vector<8x128xf32>
    %251 = vector.broadcast %11 : vector<1x128xf32> to vector<8x128xf32>
    %252 = arith.addf %250, %251 : vector<8x128xf32>
    %253 = arith.mulf %240, %252 : vector<8x128xf32>
    %254 = arith.addf %249, %253 : vector<8x128xf32>
    %255 = math.tanh %254 : vector<8x128xf32>
    %cst_44 = arith.constant 1.000000e+00 : f32
    %256 = vector.broadcast %cst_44 : f32 to vector<8x128xf32>
    %257 = arith.subf %256, %248 : vector<8x128xf32>
    %258 = arith.mulf %257, %255 : vector<8x128xf32>
    %259 = arith.mulf %248, %229 : vector<8x128xf32>
    %260 = arith.addf %258, %259 : vector<8x128xf32>
    %c0_45 = arith.constant 0 : index
    %c0_46 = arith.constant 0 : index
    %261 = vector.load %arg10[%c0_45, %c0_46] : memref<8x128xf32, #tpu.memory_space<vmem>>, vector<8x128xf32>
    tpu.vector_store %arg10[%c0_45, %c0_46], %260 {strides = array<i32>} : memref<8x128xf32, #tpu.memory_space<vmem>>, vector<8x128xf32>,
    %c0_i32_47 = arith.constant 0 : i32
    %262 = arith.cmpi eq, %arg1, %c0_i32_47 : i32
    %263 = arith.extui %262 : i1 to i32
    %c0_i32_48 = arith.constant 0 : i32
    %264 = arith.cmpi ne, %263, %c0_i32_48 : i32
    scf.if %264 {
      %265 = arith.truncf %260 : vector<8x128xf32> to vector<8x128xbf16>
      %c0_49 = arith.constant 0 : index
      %c0_50 = arith.constant 0 : index
      %266 = vector.load %arg7[%c0_49, %c0_50] : memref<128x128xbf16, #tpu.memory_space<vmem>>, vector<128x128xbf16>
      %cst_51 = arith.constant dense<0.000000e+00> : vector<8x128xf32>
      %267 = tpu.matmul %265, %266, %cst_51 {dimension_numbers = #tpu.dot_dimension_numbers<[1], [0], [0], [1], [0, 0, 1, 1], [], []>} : vector<8x128xbf16>, vector<128x128xbf16>, vector<8x128xf32> -> vector<8x128xf32>
      %c0_52 = arith.constant 0 : index
      %c0_53 = arith.constant 0 : index
      %268 = vector.load %arg8[%c0_52, %c0_53] : memref<1x128xf32, #tpu.memory_space<vmem>>, vector<1x128xf32>
      %269 = vector.broadcast %268 : vector<1x128xf32> to vector<8x128xf32>
      %270 = arith.addf %267, %269 : vector<8x128xf32>
      %cst_54 = arith.constant dense<0xFF800000> : vector<8xf32>
      %271 = vector.multi_reduction <maximumf>, %270, %cst_54 [1] : vector<8x128xf32> to vector<8xf32>
      %272 = vector.shape_cast %271 : vector<8xf32> to vector<8x1xf32>
      %273 = vector.broadcast %272 : vector<8x1xf32> to vector<8x128xf32>
      %274 = arith.subf %270, %273 : vector<8x128xf32>
      %275 = math.exp %274 : vector<8x128xf32>
      %cst_55 = arith.constant dense<0.000000e+00> : vector<8xf32>
      %276 = vector.multi_reduction <add>, %275, %cst_55 [1] : vector<8x128xf32> to vector<8xf32>
      %277 = vector.shape_cast %276 : vector<8xf32> to vector<8x1xf32>
      %278 = vector.broadcast %277 : vector<8x1xf32> to vector<8x128xf32>
      %279 = arith.divf %275, %278 : vector<8x128xf32>
      %c0_56 = arith.constant 0 : index
      %c0_57 = arith.constant 0 : index
      %280 = vector.load %arg9[%c0_56, %c0_57] : memref<8x128xf32, #tpu.memory_space<vmem>>, vector<8x128xf32>
      tpu.vector_store %arg9[%c0_56, %c0_57], %279 {strides = array<i32>} : memref<8x128xf32, #tpu.memory_space<vmem>>, vector<8x128xf32>,
    } else {
    }
    return
  }
  func.func @transform_0(%arg0: i32, %arg1: i32) -> (i32, i32, i32) {
    %c0_i32 = arith.constant 0 : i32
    %c0_i32_0 = arith.constant 0 : i32
    return %arg1, %arg0, %c0_i32 : i32, i32, i32
  }
  func.func @transform_1(%arg0: i32, %arg1: i32) -> (i32, i32) {
    %c0_i32 = arith.constant 0 : i32
    %c0_i32_0 = arith.constant 0 : i32
    %c0_i32_1 = arith.constant 0 : i32
    return %c0_i32, %c0_i32_0 : i32, i32
  }
  func.func @transform_2(%arg0: i32, %arg1: i32) -> (i32, i32) {
    %c0_i32 = arith.constant 0 : i32
    %c0_i32_0 = arith.constant 0 : i32
    %c0_i32_1 = arith.constant 0 : i32
    return %c0_i32, %c0_i32_0 : i32, i32
  }
  func.func @transform_3(%arg0: i32, %arg1: i32) -> (i32, i32) {
    %c0_i32 = arith.constant 0 : i32
    %c0_i32_0 = arith.constant 0 : i32
    %c0_i32_1 = arith.constant 0 : i32
    return %c0_i32, %c0_i32_0 : i32, i32
  }
  func.func @transform_4(%arg0: i32, %arg1: i32) -> (i32, i32) {
    %c0_i32 = arith.constant 0 : i32
    %c0_i32_0 = arith.constant 0 : i32
    %c0_i32_1 = arith.constant 0 : i32
    return %c0_i32, %c0_i32_0 : i32, i32
  }
  func.func @transform_5(%arg0: i32, %arg1: i32) -> (i32, i32) {
    %c0_i32 = arith.constant 0 : i32
    %c0_i32_0 = arith.constant 0 : i32
    %c0_i32_1 = arith.constant 0 : i32
    return %c0_i32, %c0_i32_0 : i32, i32
  }
  func.func @transform_6(%arg0: i32, %arg1: i32) -> (i32, i32) {
    %c0_i32 = arith.constant 0 : i32
    %c0_i32_0 = arith.constant 0 : i32
    %c0_i32_1 = arith.constant 0 : i32
    return %c0_i32, %c0_i32_0 : i32, i32
  }
  func.func @transform_7(%arg0: i32, %arg1: i32) -> (i32, i32) {
    %c0_i32 = arith.constant 0 : i32
    %c0_i32_0 = arith.constant 0 : i32
    return %arg0, %c0_i32 : i32, i32
  }
}

</mosaic_0001>

<bundles_post_ra>
// kernel: rnn_classifier_forward.1
= control target key start
LH: loop header
LB: loop body
LE: loop exit
PB: predicated region body
PF: predicated region fallthrough
CT: control target
= control target key end

     0   :  { %v2807_v1 = vmov 0   ;;  %v2809_v34 = vmov 0.0   ;;  %vm2070_vm0 = vmmov 0   ;;  %v2071_v53 = vmov 0.0|0.0   ;;  %s2799_s1 = inlined_call_operand.vmem [shape: bf16[128,384], index: 1, kind: input, shape index: {}]   ;;  %s2800_s0 = inlined_call_operand.vmem [shape: bf16[8,8,128], index: 0, kind: input, shape index: {}]   ;;  %s2801_s2 = inlined_call_operand.vmem [shape: bf16[128,384], index: 2, kind: input, shape index: {}]   ;;  %s2802_s3 = inlined_call_operand.vmem [shape: f32[1,384], index: 3, kind: input, shape index: {}]   ;;  %s2803_s4 = inlined_call_operand.vmem [shape: f32[1,128], index: 4, kind: input, shape index: {}]   ;;  %s2804_s5 = inlined_call_operand.vmem [shape: bf16[128,128], index: 5, kind: input, shape index: {}]   ;;  %s2805_s6 = inlined_call_operand.vmem [shape: f32[1,128], index: 6, kind: input, shape index: {}]   ;;  %s2806_s7 = inlined_call_operand.vmem [shape: f32[8,128], index: 7, kind: output, shape index: {}]  }
   0x1   :  { %v1888_v0 = vld [vmem:[%s2799_s1 + $0x4] ss:$12 sps:$4 sm:$0xff]   ;;  %273 = vmatprep.mubr.bf16.mxu0 %v2807_v1  ;;  %v1890_v2 = vld [vmem:[%s2799_s1] ss:$12 sps:$4 sm:$0xff]   ;;  %v1891_v3 = vld [vmem:[%s2799_s1 + $0x1c] ss:$12 sps:$4 sm:$0xff]   ;;  %v74_v55 = vlaneseq }
   0x2   :  { %241 = vmatprep.subr.bf16.mxu0 %v1888_v0  ;;  %v1893_v4 = vld [vmem:[%s2799_s1 + $0x18] ss:$12 sps:$4 sm:$0xff]   ;;  %v1894_v5 = vld [vmem:[%s2799_s1 + $0x34] ss:$12 sps:$4 sm:$0xff]   ;;  %v1896_v6 = vld [vmem:[%s2799_s1 + $0x30] ss:$12 sps:$4 sm:$0xff]  }
   0x3   :  { %242 = vmatpush1.bf16.msra.mxu0 %v1890_v2  ;;  %v1897_v7 = vld [vmem:[%s2799_s1 + $0x4c] ss:$12 sps:$4 sm:$0xff]   ;;  %v1908_v8 = vld [vmem:[%s2799_s1 + $0x8] ss:$12 sps:$4 sm:$0xff]   ;;  %v1900_v10 = vld [vmem:[%s2799_s1 + $0x64] ss:$12 sps:$4 sm:$0xff]  }
   0x4   :  { %243 = vmatprep.subr.bf16.mxu0 %v1891_v3  ;;  %v1899_v9 = vld [vmem:[%s2799_s1 + $0x48] ss:$12 sps:$4 sm:$0xff]   ;;  %1680 = vmatprep.subr.bf16.mxu1 %v1908_v8  ;;  %v1912_v11 = vld [vmem:[%s2799_s1 + $0x20] ss:$12 sps:$4 sm:$0xff]   ;;  %v1915_v13 = vld [vmem:[%s2799_s1 + $0x38] ss:$12 sps:$4 sm:$0xff]  }
   0x5   :  { %1681 = vmatpush3.bf16.msra.mxu1 %v1908_v8  ;;  %v1914_v12 = vld [vmem:[%s2800_s0] sm:$0xff]   ;;  %v1903_v15 = vld [vmem:[%s2799_s1 + $0x7c] ss:$12 sps:$4 sm:$0xff]   ;;  %v1910_v21 = vld [vmem:[%s2799_s1 + $0xac] ss:$12 sps:$4 sm:$0xff]   ;;  %v75_v56 = vshrl.u32 %v74_v55, 7 }
   0x6   :  { %1682 = vmatprep.subr.bf16.mxu1 %v1912_v11  ;;  %v1902_v14 = vld [vmem:[%s2799_s1 + $0x60] ss:$12 sps:$4 sm:$0xff]   ;;  %1696 = vmatprep.mubr.bf16.mxu1 %v1914_v12  ;;  %v1919_v16 = vld [vmem:[%s2799_s1 + $0x50] ss:$12 sps:$4 sm:$0xff]   ;;  %v1905_v17 = vld [vmem:[%s2799_s1 + $0x78] ss:$12 sps:$4 sm:$0xff]  }
   0x7   :  { %244 = vmatpush1.bf16.msra.mxu0 %v1893_v4  ;;  %v1906_v18 = vld [vmem:[%s2799_s1 + $0x94] ss:$12 sps:$4 sm:$0xff]   ;;  %v1909_v20 = vld [vmem:[%s2799_s1 + $0x90] ss:$12 sps:$4 sm:$0xff]   ;;  %v1933_v25 = vld [vmem:[%s2799_s1 + $0x98] ss:$12 sps:$4 sm:$0xff]  }
   0x8   :  { %245 = vmatprep.subr.bf16.mxu0 %v1894_v5  ;;  %v1924_v19 = vld [vmem:[%s2799_s1 + $0x68] ss:$12 sps:$4 sm:$0xff]   ;;  %v1928_v22 = vld [vmem:[%s2799_s1 + $0x80] ss:$12 sps:$4 sm:$0xff]   ;;  %v2185_v24 = vld [vmem:[%s2801_s2 + $0x4] ss:$12 sps:$4 sm:$0xff]  }
   0x9   :  { %1683 = vmatpush3.bf16.msra.mxu1 %v1912_v11  ;;  %v1913_v23 = vld [vmem:[%s2799_s1 + $0xa8] ss:$12 sps:$4 sm:$0xff]   ;;  %v2193_v26 = vld [vmem:[%s2801_s2] ss:$12 sps:$4 sm:$0xff]   ;;  %v1937_v28 = vld [vmem:[%s2799_s1 + $0xb0] ss:$12 sps:$4 sm:$0xff]  }
   0xa   :  { %1684 = vmatprep.subr.bf16.mxu1 %v1915_v13  ;;  %v2199_v27 = vld [vmem:[%s2801_s2 + $0x1c] ss:$12 sps:$4 sm:$0xff]   ;;  %v2208_v29 = vld [vmem:[%s2801_s2 + $0x18] ss:$12 sps:$4 sm:$0xff]   ;;  %v2215_v30 = vld [vmem:[%s2801_s2 + $0x34] ss:$12 sps:$4 sm:$0xff]  }
   0xb   :  { %246 = vmatpush1.bf16.msra.mxu0 %v1896_v6  ;;  %v1923_v31 = vld [vmem:[%s2800_s0 + $0x8] sm:$0xff]   ;;  %v2224_v32 = vld [vmem:[%s2801_s2 + $0x30] ss:$12 sps:$4 sm:$0xff]   ;;  %v2277_v42 = vld [vmem:[%s2801_s2 + $0x38] ss:$12 sps:$4 sm:$0xff]   ;;  %v76_v57 = vsub.s32 0, %v75_v56 }
   0xc   :  { %247 = vmatprep.subr.bf16.mxu0 %v1897_v7  ;;  %v2230_v33 = vld [vmem:[%s2801_s2 + $0x4c] ss:$12 sps:$4 sm:$0xff]   ;;  %v2236_v35 = vld [vmem:[%s2801_s2 + $0x8] ss:$12 sps:$4 sm:$0xff]   ;;  %v2252_v38 = vld [vmem:[%s2801_s2 + $0x64] ss:$12 sps:$4 sm:$0xff]  }
   0xd   :  { %1685 = vmatpush3.bf16.msra.mxu1 %v1915_v13  ;;  %v2242_v36 = vld [vmem:[%s2801_s2 + $0x48] ss:$12 sps:$4 sm:$0xff]   ;;  %v2258_v39 = vld [vmem:[%s2801_s2 + $0x20] ss:$12 sps:$4 sm:$0xff]   ;;  %v1941_v43 = vld [vmem:[%s2800_s0 + $0x18] sm:$0xff]   ;;  %v80_v59 = vsub.s32 1, %v75_v56 }
   0xe   :  { %1686 = vmatprep.subr.bf16.mxu1 %v1919_v16  ;;  %v1932_v37 = vld [vmem:[%s2800_s0 + $0x10] sm:$0xff]   ;;  %v2265_v40 = vld [vmem:[%s2801_s2 + $0x60] ss:$12 sps:$4 sm:$0xff]   ;;  %v2271_v41 = vld [vmem:[%s2801_s2 + $0x7c] ss:$12 sps:$4 sm:$0xff]   ;;  %v84_v4 = vsub.s32 2, %v75_v56 }
   0xf   :  { %248 = vmatpush1.bf16.msra.mxu0 %v1899_v9  ;;  %v2287_v44 = vld [vmem:[%s2801_s2 + $0x78] ss:$12 sps:$4 sm:$0xff]   ;;  %v2294_v45 = vld [vmem:[%s2801_s2 + $0x94] ss:$12 sps:$4 sm:$0xff]   ;;  %v2300_v46 = vld [vmem:[%s2801_s2 + $0x50] ss:$12 sps:$4 sm:$0xff]  }
  0x10   :  { %249 = vmatprep.subr.bf16.mxu0 %v1900_v10  ;;  %v2309_v47 = vld [vmem:[%s2801_s2 + $0x90] ss:$12 sps:$4 sm:$0xff]   ;;  %v2315_v48 = vld [vmem:[%s2801_s2 + $0xac] ss:$12 sps:$4 sm:$0xff]   ;;  %v2321_v49 = vld [vmem:[%s2801_s2 + $0x68] ss:$12 sps:$4 sm:$0xff]  }
  0x11   :  { %1687 = vmatpush3.bf16.msra.mxu1 %v1919_v16  ;;  %v2328_v50 = vld [vmem:[%s2801_s2 + $0xa8] ss:$12 sps:$4 sm:$0xff]   ;;  %v2336_v51 = vld [vmem:[%s2801_s2 + $0x80] ss:$12 sps:$4 sm:$0xff]   ;;  %v2345_v52 = vld [vmem:[%s2801_s2 + $0x98] ss:$12 sps:$4 sm:$0xff]  }
  0x12   :  { %1688 = vmatprep.subr.bf16.mxu1 %v1924_v19  ;;  %v2355_v54 = vld [vmem:[%s2801_s2 + $0xb0] ss:$12 sps:$4 sm:$0xff]   ;;  %v72_v58 = vld [vmem:[%s2802_s3] sm:$0x7] }
  0x13   :  { %250 = vmatpush1.bf16.msra.mxu0 %v1902_v14  ;;  %v77_v61 = vrot.slane %v72_v58, %v76_v57  ;;  %v81_v63 = vrot.slane %v72_v58, %v80_v59  ;;  %v2399_v6 = vrot.slane %v72_v58, %v84_v4 }
  0x14   :  { %251 = vmatprep.subr.bf16.mxu0 %v1903_v15 }
  0x15   :  { %1689 = vmatpush3.bf16.msra.mxu1 %v1924_v19 }
  0x16   :  { %1690 = vmatprep.subr.bf16.mxu1 %v1928_v22 }
  0x17   :  { %252 = vmatpush1.bf16.msra.mxu0 %v1905_v17 }
  0x18   :  { %253 = vmatprep.subr.bf16.mxu0 %v1906_v18 }
  0x19   :  { %1691 = vmatpush3.bf16.msra.mxu1 %v1928_v22 }
  0x1a   :  { %1692 = vmatprep.subr.bf16.mxu1 %v1933_v25 }
  0x1b   :  { %254 = vmatpush1.bf16.msra.mxu0 %v1909_v20 }
  0x1c   :  { %255 = vmatprep.subr.bf16.mxu0 %v1910_v21 }
  0x1d   :  { %1693 = vmatpush3.bf16.msra.mxu1 %v1933_v25 }
  0x1e   :  { %1694 = vmatprep.subr.bf16.mxu1 %v1937_v28 }
  0x1f   :  { %256 = vmatpush1.bf16.msra.mxu0 %v1913_v23 }
  0x20   :  { %542 = vmatprep.subr.bf16.mxu0 %v2185_v24 }
  0x21   :  { %1695 = vmatpush3.bf16.msra.mxu1 %v1937_v28 }
  0x22   :  { %274 = vmatmul.mubr.bf16.vlgmr.msra.gmra.mrb[0].mxu0 %v1914_v12  ;;  %1704 = vmatprep.subr.bf16.mxu1 %v2809_v34 }
  0x23   :  { %543 = vmatpush1.bf16.msra.mxu0 %v2193_v26  ;;  %283 = vmatprep.mubr.bf16.mxu0 %v2807_v1 }
  0x24   :  { %544 = vmatprep.subr.bf16.mxu0 %v2199_v27  ;;  %1697 = vmatmul.mubr.bf16.vlgmr.msra.gmra.mrb[0].mxu1 %v1923_v31 }
  0x25   :  { %1705 = vmatpush3.bf16.msra.mxu1 %v2236_v35  ;;  %1700 = vmatprep.mubr.bf16.mxu1 %v1932_v37 }
  0x26   :  { %1706 = vmatprep.subr.bf16.mxu1 %v2809_v34 }
  0x27   :  { %545 = vmatpush1.bf16.msra.mxu0 %v2208_v29 }
  0x28   :  { %546 = vmatprep.subr.bf16.mxu0 %v2215_v30 }
  0x29   :  { %1707 = vmatpush3.bf16.msra.mxu1 %v2258_v39 }
  0x2a   :  { %284 = vmatmul.mubr.bf16.gmra.mrb[4].mxu0 %v1923_v31  ;;  %1708 = vmatprep.subr.bf16.mxu1 %v2809_v34 }
  0x2b   :  { %547 = vmatpush1.bf16.msra.mxu0 %v2224_v32  ;;  %293 = vmatprep.mubr.bf16.mxu0 %v2807_v1 }
  0x2c   :  { %548 = vmatprep.subr.bf16.mxu0 %v2230_v33  ;;  %1701 = vmatmul.mubr.bf16.gmra.mrb[4].mxu1 %v1941_v43 }
  0x2d   :  { %1709 = vmatpush3.bf16.msra.mxu1 %v2277_v42  ;;  %1720 = vmatprep.mubr.msk.bf16.mxu1 %vm2070_vm0, %v2809_v34 }
  0x2e   :  { %1710 = vmatprep.subr.bf16.mxu1 %v2809_v34 }
  0x2f   :  { %549 = vmatpush1.bf16.msra.mxu0 %v2242_v36 }
  0x30   :  { %550 = vmatprep.subr.bf16.mxu0 %v2252_v38 }
  0x31   :  { %1711 = vmatpush3.bf16.msra.mxu1 %v2300_v46 }
  0x32   :  { %294 = vmatmul.mubr.bf16.gmra.mrb[8].mxu0 %v1932_v37  ;;  %1712 = vmatprep.subr.bf16.mxu1 %v2809_v34 }
  0x33   :  { %551 = vmatpush1.bf16.msra.mxu0 %v2265_v40  ;;  %303 = vmatprep.mubr.bf16.mxu0 %v2807_v1 }
  0x34   :  { %552 = vmatprep.subr.bf16.mxu0 %v2271_v41 }
  0x35   :  { %1713 = vmatpush3.bf16.msra.mxu1 %v2321_v49 }
  0x36   :  { %1714 = vmatprep.subr.bf16.mxu1 %v2809_v34 }
  0x37   :  { %553 = vmatpush1.bf16.msra.mxu0 %v2287_v44 }
  0x38   :  { %554 = vmatprep.subr.bf16.mxu0 %v2294_v45 }
  0x39   :  { %1715 = vmatpush3.bf16.msra.mxu1 %v2336_v51 }
  0x3a   :  { %304 = vmatmul.mubr.bf16.gmra.mrb[12].mxu0 %v1941_v43  ;;  %1716 = vmatprep.subr.bf16.mxu1 %v2809_v34 }
  0x3b   :  { %555 = vmatpush1.bf16.msra.mxu0 %v2309_v47  ;;  %574 = vmatprep.mubr.bf16.mxu0 %v2807_v1 }
  0x3c   :  { %556 = vmatprep.subr.bf16.mxu0 %v2315_v48 }
  0x3d   :  { %1717 = vmatpush3.bf16.msra.mxu1 %v2345_v52 }
  0x3e   :  { %1718 = vmatprep.subr.bf16.mxu1 %v2809_v34 }
  0x3f   :  { %557 = vmatpush1.bf16.msra.mxu0 %v2328_v50 }
  0x40   :  { %652 = vmatprep.subr.bf16.mxu0 %v2185_v24 }
  0x41   :  { %1719 = vmatpush3.bf16.msra.mxu1 %v2355_v54 }
  0x42   :  { %575 = vmatmul.mubr.bf16.vlgmr.msra.gmra.mrb[16].mxu0 %v2071_v53  ;;  %1724 = vmatprep.subr.bf16.mxu1 %v2809_v34 }
  0x43   :  { %653 = vmatpush1.bf16.msra.mxu0 %v2193_v26  ;;  %684 = vmatprep.mubr.bf16.mxu0 %v2807_v1 }
  0x44   :  { %654 = vmatprep.subr.bf16.mxu0 %v2199_v27  ;;  %1721 = vmatmul.mubr.bf16.vlgmr.msra.gmra.mrb[8].mxu1 %v2071_v53 }
  0x45   :  { %1725 = vmatpush3.bf16.msra.mxu1 %v2236_v35  ;;  %1740 = vmatprep.mubr.msk.bf16.mxu1 %vm2070_vm0, %v2809_v34 }
  0x46   :  { %1726 = vmatprep.subr.bf16.mxu1 %v2809_v34 }
  0x47   :  { %655 = vmatpush1.bf16.msra.mxu0 %v2208_v29 }
  0x48   :  { %656 = vmatprep.subr.bf16.mxu0 %v2215_v30 }
  0x49   :  { %1727 = vmatpush3.bf16.msra.mxu1 %v2258_v39 }
  0x4a   :  { %1728 = vmatprep.subr.bf16.mxu1 %v2809_v34 }
  0x4b   :  { %657 = vmatpush1.bf16.msra.mxu0 %v2224_v32 }
  0x4c   :  { %658 = vmatprep.subr.bf16.mxu0 %v2230_v33 }
  0x4d   :  { %1729 = vmatpush3.bf16.msra.mxu1 %v2277_v42 }
  0x4e   :  { %1730 = vmatprep.subr.bf16.mxu1 %v2809_v34 }
  0x4f   :  { %659 = vmatpush1.bf16.msra.mxu0 %v2242_v36 }
  0x50   :  { %660 = vmatprep.subr.bf16.mxu0 %v2252_v38 }
  0x51   :  { %1731 = vmatpush3.bf16.msra.mxu1 %v2300_v46 }
  0x52   :  { %1732 = vmatprep.subr.bf16.mxu1 %v2809_v34 }
  0x53   :  { %661 = vmatpush1.bf16.msra.mxu0 %v2265_v40 }
  0x54   :  { %662 = vmatprep.subr.bf16.mxu0 %v2271_v41 }
  0x55   :  { %1733 = vmatpush3.bf16.msra.mxu1 %v2321_v49 }
  0x56   :  { %1734 = vmatprep.subr.bf16.mxu1 %v2809_v34 }
  0x57   :  { %663 = vmatpush1.bf16.msra.mxu0 %v2287_v44 }
  0x58   :  { %664 = vmatprep.subr.bf16.mxu0 %v2294_v45 }
  0x59   :  { %1735 = vmatpush3.bf16.msra.mxu1 %v2336_v51 }
  0x5a   :  { %1736 = vmatprep.subr.bf16.mxu1 %v2809_v34 }
  0x5b   :  { %665 = vmatpush1.bf16.msra.mxu0 %v2309_v47 }
  0x5c   :  { %666 = vmatprep.subr.bf16.mxu0 %v2315_v48 }
  0x5d   :  { %1737 = vmatpush3.bf16.msra.mxu1 %v2345_v52 }
  0x5e   :  { %1738 = vmatprep.subr.bf16.mxu1 %v2809_v34 }
  0x5f   :  { %667 = vmatpush1.bf16.msra.mxu0 %v2328_v50 }
  0x60   :  { %756 = vmatprep.subr.bf16.mxu0 %v2185_v24 }
  0x61   :  { %1739 = vmatpush3.bf16.msra.mxu1 %v2355_v54 }
  0x62   :  { %1744 = vmatprep.subr.bf16.mxu1 %v2809_v34 }
  0xf5   :  { %v275_v60 = vpop.f32.mrb[0].mxu0 }
  0xf6   :  { %v277_v62 = vpop.f32.mrb[1].mxu0 }
  0xf7   :  { %v279_v0 = vpop.f32.mrb[2].mxu0  ;;  %v1698_v12 = vpop.f32.mrb[0].mxu1 }
  0xf8   :  { %v2395_v2 = vadd.f32 %v279_v0, %v77_v61  ;;  %v281_v3 = vpop.f32.mrb[3].mxu0  ;;  %v2408_v15 = vadd.f32 %v1698_v12, %v2399_v6  ;;  %v348_v16 = vpop.f32.mrb[1].mxu1 }
  0xf9   :  { %v2397_v5 = vadd.f32 %v281_v3, %v81_v63  ;;  %v1699_v18 = vpop.f32.mrb[2].mxu1 }
  0xfa   :  { %v2413_v19 = vadd.f32 %v1699_v18, %v2399_v6  ;;  %v351_v20 = vpop.f32.mrb[3].mxu1 }
  0xfb   :  { %v2416_v21 = vadd.f32 %v351_v20, %v2399_v6 }
  0xfd   :  { %v285_v7 = vpop.f32.mrb[4].mxu0 }
  0xfe   :  { %v2401_v8 = vadd.f32 %v285_v7, %v77_v61  ;;  %v287_v9 = vpop.f32.mrb[5].mxu0 }
  0xff   :  { %v2403_v10 = vadd.f32 %v287_v9, %v81_v63  ;;  %v289_v11 = vpop.f32.mrb[6].mxu0  ;;  %v1702_v37 = vpop.f32.mrb[4].mxu1 }
 0x100   :  { %v2405_v13 = vadd.f32 %v289_v11, %v77_v61  ;;  %v291_v14 = vpop.f32.mrb[7].mxu0  ;;  %v2425_v55 = vadd.f32 %v1702_v37, %v2399_v6  ;;  %v364_v56 = vpop.f32.mrb[5].mxu1 }
 0x101   :  { %v2410_v17 = vadd.f32 %v291_v14, %v81_v63  ;;  %v2430_v58 = vadd.f32 %v364_v56, %v2399_v6  ;;  %v1703_v59 = vpop.f32.mrb[6].mxu1 }
 0x102   :  { %2811 = vst [vmem:[#allocation3_spill] sm:$0xff] %v2425_v55  ;;  %v2433_v0 = vadd.f32 %v1703_v59, %v2399_v6  ;;  %v367_v3 = vpop.f32.mrb[7].mxu1 }
 0x103   :  { %v2436_v4 = vadd.f32 %v367_v3, %v2399_v6 }
 0x104   :  { %2812 = vst [vmem:[#allocation4_spill] sm:$0xff] %v2433_v0 }
 0x105   :  { %v295_v22 = vpop.f32.mrb[8].mxu0 }
 0x106   :  { %v2418_v23 = vadd.f32 %v295_v22, %v77_v61  ;;  %v297_v25 = vpop.f32.mrb[9].mxu0 }
 0x107   :  { %v2420_v28 = vadd.f32 %v297_v25, %v81_v63  ;;  %v299_v31 = vpop.f32.mrb[10].mxu0  ;;  %v276_v25 = vadd.f32 %v275_v60, %v77_v61  ;;  %v2449_v60 = vld [vmem:[%s2803_s4] ss:$0 sm:$0xff] }
 0x108   :  { %v2422_v43 = vadd.f32 %v299_v31, %v77_v61  ;;  %v301_v53 = vpop.f32.mrb[11].mxu0  ;;  %v278_v31 = vadd.f32 %v277_v62, %v81_v63 }
 0x109   :  { %v2427_v57 = vadd.f32 %v301_v53, %v81_v63 }
 0x10d   :  { %v305_v7 = vpop.f32.mrb[12].mxu0 }
 0x10e   :  { %v2438_v9 = vadd.f32 %v305_v7, %v77_v61  ;;  %v307_v11 = vpop.f32.mrb[13].mxu0 }
 0x10f   :  { %v2440_v12 = vadd.f32 %v307_v11, %v81_v63  ;;  %v309_v14 = vpop.f32.mrb[14].mxu0 }
 0x110   :  { %v2442_v18 = vadd.f32 %v309_v14, %v77_v61  ;;  %v311_v20 = vpop.f32.mrb[15].mxu0 }
 0x111   :  { %2813 = vst [vmem:[#allocation5_spill] sm:$0xff] %v2440_v12  ;;  %v2444_v22 = vadd.f32 %v311_v20, %v81_v63 }
 0x112   :  { %2814 = vst [vmem:[#allocation6_spill] sm:$0xff] %v2442_v18 }
 0x115   :  { %v576_v37 = vpop.f32.mrb[16].mxu0 }
 0x116   :  { %v623_v53 = vadd.f32 %v576_v37, %v276_v25  ;;  %v578_v56 = vpop.f32.mrb[17].mxu0 }
 0x117   :  { %v630_v59 = vadd.f32 %v578_v56, %v278_v31  ;;  %v580_v3 = vpop.f32.mrb[18].mxu0  ;;  %v617_v0 = vpop.f32.mrb[8].mxu1 }
 0x118   :  { %v1561_v1 = vmul.f32 -1.442695, %v623_v53  ;;  %v581_v34 = vpop.f32.mrb[19].mxu0  ;;  %v1722_v11 = vpop.f32.mrb[9].mxu1  ;;  %v643_v62 = vadd.f32 %v2449_v60, %v617_v0 }
 0x119   :  { %v1562_v7 = vmul.f32 -1.442695, %v630_v59  ;;  %v620_v55 = vpop.f32.mrb[10].mxu1 }
 0x11a   :  { %1964 = vpow2.f32 %v1561_v1  ;;  %v1723_v14 = vpop.f32.mrb[11].mxu1  ;;  %v349_v1 = vadd.f32 %v348_v16, %v2399_v6  ;;  %v2815_v6 = vmov 0.0   ;;  %v2816_v16 = vmov 0  }
 0x11b   :  { %1966 = vpow2.f32 %v1562_v7 }
 0x124   :  { %v1965_v18 = vpop.eup %1964 }
 0x125   :  { %v627_v12 = vadd.f32 1.0, %v1965_v18  ;;  %v1967_v20 = vpop.eup %1966 }
 0x126   :  { %v634_v61 = vadd.f32 1.0, %v1967_v20 }
 0x127   :  { %1968 = vrcp.f32 %v627_v12 }
 0x128   :  { %1970 = vrcp.f32 %v634_v61 }
 0x131   :  { %v1969_v34 = vpop.eup %1968 }
 0x132   :  { %v644_v63 = vmul.f32 %v1969_v34, %v643_v62  ;;  %v1971_v55 = vpop.eup %1970 }
 0x133   :  { %v647_v31 = vsub.f32 1.0, %v1971_v55  ;;  %v649_v37 = vmul.f32 0.0, %v1971_v55 }
 0x134   :  { %v645_v25 = vadd.f32 %v644_v63, %v349_v1 }
 0x136   :  { %1972 = vtanh.f32 %v645_v25 }
 0x140   :  { %v1973_v18 = vpop.eup %1972 }
 0x141   :  { %v648_v12 = vmul.f32 %v1973_v18, %v647_v31 }
 0x143   :  { %v2453_v53 = vadd.f32 %v649_v37, %v648_v12 }
 0x145   :  { %v651_v56 = vpack.c.bf16 %v2453_v53, %v2453_v53 }
 0x147   :  { %685 = vmatmul.mubr.bf16.vlgmr.msra.gmra.mrb[20].mxu0 %v651_v56  ;;  %1741 = vmatmul.mubr.bf16.vlgmr.msra.gmra.mrb[12].mxu1 %v651_v56 }
 0x148   :  { %757 = vmatpush1.bf16.msra.mxu0 %v2193_v26  ;;  %1745 = vmatpush3.bf16.msra.mxu1 %v2236_v35 }
 0x149   :  { %758 = vmatprep.subr.bf16.mxu0 %v2199_v27  ;;  %1746 = vmatprep.subr.bf16.mxu1 %v2815_v6 }
 0x14a   :  { %788 = vmatprep.mubr.bf16.mxu0 %v2816_v16  ;;  %1760 = vmatprep.mubr.msk.bf16.mxu1 %vm2070_vm0, %v2815_v6 }
 0x14c   :  { %759 = vmatpush1.bf16.msra.mxu0 %v2208_v29  ;;  %1747 = vmatpush3.bf16.msra.mxu1 %v2258_v39 }
 0x14d   :  { %760 = vmatprep.subr.bf16.mxu0 %v2215_v30  ;;  %1748 = vmatprep.subr.bf16.mxu1 %v2815_v6 }
 0x150   :  { %761 = vmatpush1.bf16.msra.mxu0 %v2224_v32  ;;  %1749 = vmatpush3.bf16.msra.mxu1 %v2277_v42 }
 0x151   :  { %762 = vmatprep.subr.bf16.mxu0 %v2230_v33  ;;  %1750 = vmatprep.subr.bf16.mxu1 %v2815_v6 }
 0x154   :  { %763 = vmatpush1.bf16.msra.mxu0 %v2242_v36  ;;  %1751 = vmatpush3.bf16.msra.mxu1 %v2300_v46 }
 0x155   :  { %764 = vmatprep.subr.bf16.mxu0 %v2252_v38  ;;  %1752 = vmatprep.subr.bf16.mxu1 %v2815_v6 }
 0x158   :  { %765 = vmatpush1.bf16.msra.mxu0 %v2265_v40  ;;  %1753 = vmatpush3.bf16.msra.mxu1 %v2321_v49 }
 0x159   :  { %766 = vmatprep.subr.bf16.mxu0 %v2271_v41  ;;  %1754 = vmatprep.subr.bf16.mxu1 %v2815_v6 }
 0x15c   :  { %767 = vmatpush1.bf16.msra.mxu0 %v2287_v44  ;;  %1755 = vmatpush3.bf16.msra.mxu1 %v2336_v51 }
 0x15d   :  { %768 = vmatprep.subr.bf16.mxu0 %v2294_v45  ;;  %1756 = vmatprep.subr.bf16.mxu1 %v2815_v6 }
 0x160   :  { %769 = vmatpush1.bf16.msra.mxu0 %v2309_v47  ;;  %1757 = vmatpush3.bf16.msra.mxu1 %v2345_v52 }
 0x161   :  { %770 = vmatprep.subr.bf16.mxu0 %v2315_v48  ;;  %1758 = vmatprep.subr.bf16.mxu1 %v2815_v6 }
 0x164   :  { %771 = vmatpush1.bf16.msra.mxu0 %v2328_v50  ;;  %1759 = vmatpush3.bf16.msra.mxu1 %v2355_v54 }
 0x165   :  { %860 = vmatprep.subr.bf16.mxu0 %v2185_v24  ;;  %1764 = vmatprep.subr.bf16.mxu1 %v2815_v6 }
 0x21a   :  { %v686_v0 = vpop.f32.mrb[20].mxu0  ;;  %v727_v59 = vpop.f32.mrb[12].mxu1 }
 0x21b   :  { %v733_v3 = vadd.f32 %v686_v0, %v2395_v2  ;;  %v688_v7 = vpop.f32.mrb[21].mxu0  ;;  %v1742_v11 = vpop.f32.mrb[13].mxu1  ;;  %v747_v12 = vadd.f32 %v2449_v60, %v727_v59 }
 0x21c   :  { %v740_v14 = vadd.f32 %v688_v7, %v2397_v5  ;;  %v690_v20 = vpop.f32.mrb[22].mxu0  ;;  %v730_v61 = vpop.f32.mrb[14].mxu1 }
 0x21d   :  { %v1564_v62 = vmul.f32 -1.442695, %v733_v3  ;;  %v691_v34 = vpop.f32.mrb[23].mxu0  ;;  %v1743_v1 = vpop.f32.mrb[15].mxu1 }
 0x21e   :  { %v1565_v63 = vmul.f32 -1.442695, %v740_v14 }
 0x21f   :  { %1974 = vpow2.f32 %v1564_v62 }
 0x220   :  { %1976 = vpow2.f32 %v1565_v63 }
 0x229   :  { %v1975_v25 = vpop.eup %1974 }
 0x22a   :  { %v737_v55 = vadd.f32 1.0, %v1975_v25  ;;  %v1977_v31 = vpop.eup %1976 }
 0x22b   :  { %v744_v18 = vadd.f32 1.0, %v1977_v31 }
 0x22c   :  { %1978 = vrcp.f32 %v737_v55 }
 0x22d   :  { %1980 = vrcp.f32 %v744_v18 }
 0x236   :  { %v1979_v2 = vpop.eup %1978 }
 0x237   :  { %v748_v37 = vmul.f32 %v1979_v2, %v747_v12  ;;  %v1981_v56 = vpop.eup %1980 }
 0x238   :  { %v751_v0 = vsub.f32 1.0, %v1981_v56  ;;  %v753_v11 = vmul.f32 %v1981_v56, %v2453_v53 }
 0x239   :  { %v749_v5 = vadd.f32 %v748_v37, %v2416_v21 }
 0x23b   :  { %1982 = vtanh.f32 %v749_v5 }
 0x245   :  { %v1983_v3 = vpop.eup %1982 }
 0x246   :  { %v752_v7 = vmul.f32 %v1983_v3, %v751_v0 }
 0x248   :  { %v2497_v14 = vadd.f32 %v753_v11, %v752_v7 }
 0x24a   :  { %v755_v20 = vpack.c.bf16 %v2497_v14, %v2497_v14 }
 0x24c   :  { %789 = vmatmul.mubr.bf16.vlgmr.msra.gmra.mrb[24].mxu0 %v755_v20  ;;  %1761 = vmatmul.mubr.bf16.vlgmr.msra.gmra.mrb[16].mxu1 %v755_v20 }
 0x24d   :  { %861 = vmatpush1.bf16.msra.mxu0 %v2193_v26  ;;  %1765 = vmatpush3.bf16.msra.mxu1 %v2236_v35 }
 0x24e   :  { %862 = vmatprep.subr.bf16.mxu0 %v2199_v27  ;;  %1766 = vmatprep.subr.bf16.mxu1 %v2815_v6 }
 0x24f   :  { %892 = vmatprep.mubr.bf16.mxu0 %v2816_v16  ;;  %1780 = vmatprep.mubr.msk.bf16.mxu1 %vm2070_vm0, %v2815_v6 }
 0x251   :  { %863 = vmatpush1.bf16.msra.mxu0 %v2208_v29  ;;  %1767 = vmatpush3.bf16.msra.mxu1 %v2258_v39 }
 0x252   :  { %864 = vmatprep.subr.bf16.mxu0 %v2215_v30  ;;  %1768 = vmatprep.subr.bf16.mxu1 %v2815_v6 }
 0x255   :  { %865 = vmatpush1.bf16.msra.mxu0 %v2224_v32  ;;  %1769 = vmatpush3.bf16.msra.mxu1 %v2277_v42 }
 0x256   :  { %866 = vmatprep.subr.bf16.mxu0 %v2230_v33  ;;  %1770 = vmatprep.subr.bf16.mxu1 %v2815_v6 }
 0x259   :  { %867 = vmatpush1.bf16.msra.mxu0 %v2242_v36  ;;  %1771 = vmatpush3.bf16.msra.mxu1 %v2300_v46 }
 0x25a   :  { %868 = vmatprep.subr.bf16.mxu0 %v2252_v38  ;;  %1772 = vmatprep.subr.bf16.mxu1 %v2815_v6 }
 0x25d   :  { %869 = vmatpush1.bf16.msra.mxu0 %v2265_v40  ;;  %1773 = vmatpush3.bf16.msra.mxu1 %v2321_v49 }
 0x25e   :  { %870 = vmatprep.subr.bf16.mxu0 %v2271_v41  ;;  %1774 = vmatprep.subr.bf16.mxu1 %v2815_v6 }
 0x261   :  { %871 = vmatpush1.bf16.msra.mxu0 %v2287_v44  ;;  %1775 = vmatpush3.bf16.msra.mxu1 %v2336_v51 }
 0x262   :  { %872 = vmatprep.subr.bf16.mxu0 %v2294_v45  ;;  %1776 = vmatprep.subr.bf16.mxu1 %v2815_v6 }
 0x265   :  { %873 = vmatpush1.bf16.msra.mxu0 %v2309_v47  ;;  %1777 = vmatpush3.bf16.msra.mxu1 %v2345_v52 }
 0x266   :  { %874 = vmatprep.subr.bf16.mxu0 %v2315_v48  ;;  %1778 = vmatprep.subr.bf16.mxu1 %v2815_v6 }
 0x269   :  { %875 = vmatpush1.bf16.msra.mxu0 %v2328_v50  ;;  %1779 = vmatpush3.bf16.msra.mxu1 %v2355_v54 }
 0x26a   :  { %964 = vmatprep.subr.bf16.mxu0 %v2185_v24  ;;  %1784 = vmatprep.subr.bf16.mxu1 %v2815_v6 }
 0x31f   :  { %v790_v21 = vpop.f32.mrb[24].mxu0  ;;  %v831_v53 = vpop.f32.mrb[16].mxu1 }
 0x320   :  { %v837_v59 = vadd.f32 %v790_v21, %v2401_v8  ;;  %v792_v61 = vpop.f32.mrb[25].mxu0  ;;  %v1762_v62 = vpop.f32.mrb[17].mxu1  ;;  %v851_v56 = vadd.f32 %v2449_v60, %v831_v53 }
 0x321   :  { %v844_v34 = vadd.f32 %v792_v61, %v2403_v10  ;;  %v794_v1 = vpop.f32.mrb[26].mxu0  ;;  %v834_v63 = vpop.f32.mrb[18].mxu1 }
 0x322   :  { %v1566_v25 = vmul.f32 -1.442695, %v837_v59  ;;  %v795_v55 = vpop.f32.mrb[27].mxu0  ;;  %v1763_v31 = vpop.f32.mrb[19].mxu1 }
 0x323   :  { %v1567_v18 = vmul.f32 -1.442695, %v844_v34 }
 0x324   :  { %1984 = vpow2.f32 %v1566_v25 }
 0x325   :  { %1986 = vpow2.f32 %v1567_v18 }
 0x32e   :  { %v1985_v12 = vpop.eup %1984 }
 0x32f   :  { %v841_v2 = vadd.f32 1.0, %v1985_v12  ;;  %v1987_v37 = vpop.eup %1986 }
 0x330   :  { %v848_v5 = vadd.f32 1.0, %v1987_v37 }
 0x331   :  { %1988 = vrcp.f32 %v841_v2 }
 0x332   :  { %1990 = vrcp.f32 %v848_v5 }
 0x33b   :  { %v1989_v8 = vpop.eup %1988 }
 0x33c   :  { %v852_v0 = vmul.f32 %v1989_v8, %v851_v56  ;;  %v1991_v3 = vpop.eup %1990 }
 0x33d   :  { %v855_v7 = vsub.f32 1.0, %v1991_v3  ;;  %v857_v21 = vmul.f32 %v1991_v3, %v2497_v14 }
 0x33e   :  { %v853_v10 = vadd.f32 %v852_v0, %v2408_v15 }
 0x340   :  { %1992 = vtanh.f32 %v853_v10 }
 0x34a   :  { %v1993_v11 = vpop.eup %1992 }
 0x34b   :  { %v856_v20 = vmul.f32 %v1993_v11, %v855_v7 }
 0x34d   :  { %v2541_v59 = vadd.f32 %v857_v21, %v856_v20 }
 0x34f   :  { %v859_v61 = vpack.c.bf16 %v2541_v59, %v2541_v59 }
 0x351   :  { %893 = vmatmul.mubr.bf16.vlgmr.msra.gmra.mrb[28].mxu0 %v859_v61  ;;  %1781 = vmatmul.mubr.bf16.vlgmr.msra.gmra.mrb[20].mxu1 %v859_v61 }
 0x352   :  { %965 = vmatpush1.bf16.msra.mxu0 %v2193_v26  ;;  %1785 = vmatpush3.bf16.msra.mxu1 %v2236_v35 }
 0x353   :  { %966 = vmatprep.subr.bf16.mxu0 %v2199_v27  ;;  %1786 = vmatprep.subr.bf16.mxu1 %v2815_v6 }
 0x354   :  { %996 = vmatprep.mubr.bf16.mxu0 %v2816_v16  ;;  %1800 = vmatprep.mubr.msk.bf16.mxu1 %vm2070_vm0, %v2815_v6 }
 0x356   :  { %967 = vmatpush1.bf16.msra.mxu0 %v2208_v29  ;;  %1787 = vmatpush3.bf16.msra.mxu1 %v2258_v39 }
 0x357   :  { %968 = vmatprep.subr.bf16.mxu0 %v2215_v30  ;;  %1788 = vmatprep.subr.bf16.mxu1 %v2815_v6 }
 0x35a   :  { %969 = vmatpush1.bf16.msra.mxu0 %v2224_v32  ;;  %1789 = vmatpush3.bf16.msra.mxu1 %v2277_v42 }
 0x35b   :  { %970 = vmatprep.subr.bf16.mxu0 %v2230_v33  ;;  %1790 = vmatprep.subr.bf16.mxu1 %v2815_v6 }
 0x35e   :  { %971 = vmatpush1.bf16.msra.mxu0 %v2242_v36  ;;  %1791 = vmatpush3.bf16.msra.mxu1 %v2300_v46 }
 0x35f   :  { %972 = vmatprep.subr.bf16.mxu0 %v2252_v38  ;;  %1792 = vmatprep.subr.bf16.mxu1 %v2815_v6 }
 0x362   :  { %973 = vmatpush1.bf16.msra.mxu0 %v2265_v40  ;;  %1793 = vmatpush3.bf16.msra.mxu1 %v2321_v49 }
 0x363   :  { %974 = vmatprep.subr.bf16.mxu0 %v2271_v41  ;;  %1794 = vmatprep.subr.bf16.mxu1 %v2815_v6 }
 0x366   :  { %975 = vmatpush1.bf16.msra.mxu0 %v2287_v44  ;;  %1795 = vmatpush3.bf16.msra.mxu1 %v2336_v51 }
 0x367   :  { %976 = vmatprep.subr.bf16.mxu0 %v2294_v45  ;;  %1796 = vmatprep.subr.bf16.mxu1 %v2815_v6 }
 0x36a   :  { %977 = vmatpush1.bf16.msra.mxu0 %v2309_v47  ;;  %1797 = vmatpush3.bf16.msra.mxu1 %v2345_v52 }
 0x36b   :  { %978 = vmatprep.subr.bf16.mxu0 %v2315_v48  ;;  %1798 = vmatprep.subr.bf16.mxu1 %v2815_v6 }
 0x36e   :  { %979 = vmatpush1.bf16.msra.mxu0 %v2328_v50  ;;  %1799 = vmatpush3.bf16.msra.mxu1 %v2355_v54 }
 0x36f   :  { %1068 = vmatprep.subr.bf16.mxu0 %v2185_v24  ;;  %1804 = vmatprep.subr.bf16.mxu1 %v2815_v6 }
 0x424   :  { %v894_v15 = vpop.f32.mrb[28].mxu0  ;;  %v935_v14 = vpop.f32.mrb[20].mxu1 }
 0x425   :  { %v941_v53 = vadd.f32 %v894_v15, %v2405_v13  ;;  %v896_v62 = vpop.f32.mrb[29].mxu0  ;;  %v1782_v34 = vpop.f32.mrb[21].mxu1  ;;  %v955_v8 = vadd.f32 %v2449_v60, %v935_v14 }
 0x426   :  { %v948_v1 = vadd.f32 %v896_v62, %v2410_v17  ;;  %v898_v63 = vpop.f32.mrb[30].mxu0  ;;  %v938_v25 = vpop.f32.mrb[22].mxu1 }
 0x427   :  { %v1568_v55 = vmul.f32 -1.442695, %v941_v53  ;;  %v899_v31 = vpop.f32.mrb[31].mxu0  ;;  %v1783_v18 = vpop.f32.mrb[23].mxu1 }
 0x428   :  { %v1569_v12 = vmul.f32 -1.442695, %v948_v1 }
 0x429   :  { %1994 = vpow2.f32 %v1568_v55 }
 0x42a   :  { %1996 = vpow2.f32 %v1569_v12 }
 0x433   :  { %v1995_v2 = vpop.eup %1994 }
 0x434   :  { %v945_v37 = vadd.f32 1.0, %v1995_v2  ;;  %v1997_v5 = vpop.eup %1996 }
 0x435   :  { %v952_v56 = vadd.f32 1.0, %v1997_v5 }
 0x436   :  { %1998 = vrcp.f32 %v945_v37 }
 0x437   :  { %2000 = vrcp.f32 %v952_v56 }
 0x440   :  { %v1999_v13 = vpop.eup %1998 }
 0x441   :  { %v956_v0 = vmul.f32 %v1999_v13, %v955_v8  ;;  %v2001_v10 = vpop.eup %2000 }
 0x442   :  { %v959_v3 = vsub.f32 1.0, %v2001_v10  ;;  %v961_v20 = vmul.f32 %v2001_v10, %v2541_v59 }
 0x443   :  { %v957_v17 = vadd.f32 %v956_v0, %v2413_v19 }
 0x445   :  { %2002 = vtanh.f32 %v957_v17 }
 0x44f   :  { %v2003_v7 = vpop.eup %2002 }
 0x450   :  { %v960_v11 = vmul.f32 %v2003_v7, %v959_v3 }
 0x452   :  { %v2585_v21 = vadd.f32 %v961_v20, %v960_v11 }
 0x454   :  { %v963_v61 = vpack.c.bf16 %v2585_v21, %v2585_v21 }
 0x456   :  { %997 = vmatmul.mubr.bf16.vlgmr.msra.gmra.mrb[32].mxu0 %v963_v61  ;;  %1801 = vmatmul.mubr.bf16.vlgmr.msra.gmra.mrb[24].mxu1 %v963_v61 }
 0x457   :  { %1069 = vmatpush1.bf16.msra.mxu0 %v2193_v26  ;;  %1805 = vmatpush3.bf16.msra.mxu1 %v2236_v35 }
 0x458   :  { %1070 = vmatprep.subr.bf16.mxu0 %v2199_v27  ;;  %1806 = vmatprep.subr.bf16.mxu1 %v2815_v6 }
 0x459   :  { %1100 = vmatprep.mubr.bf16.mxu0 %v2816_v16  ;;  %1820 = vmatprep.mubr.msk.bf16.mxu1 %vm2070_vm0, %v2815_v6 }
 0x45b   :  { %1071 = vmatpush1.bf16.msra.mxu0 %v2208_v29  ;;  %1807 = vmatpush3.bf16.msra.mxu1 %v2258_v39 }
 0x45c   :  { %1072 = vmatprep.subr.bf16.mxu0 %v2215_v30  ;;  %1808 = vmatprep.subr.bf16.mxu1 %v2815_v6 }
 0x45f   :  { %1073 = vmatpush1.bf16.msra.mxu0 %v2224_v32  ;;  %1809 = vmatpush3.bf16.msra.mxu1 %v2277_v42 }
 0x460   :  { %1074 = vmatprep.subr.bf16.mxu0 %v2230_v33  ;;  %1810 = vmatprep.subr.bf16.mxu1 %v2815_v6 }
 0x463   :  { %1075 = vmatpush1.bf16.msra.mxu0 %v2242_v36  ;;  %1811 = vmatpush3.bf16.msra.mxu1 %v2300_v46 }
 0x464   :  { %1076 = vmatprep.subr.bf16.mxu0 %v2252_v38  ;;  %1812 = vmatprep.subr.bf16.mxu1 %v2815_v6 }
 0x467   :  { %1077 = vmatpush1.bf16.msra.mxu0 %v2265_v40  ;;  %1813 = vmatpush3.bf16.msra.mxu1 %v2321_v49 }
 0x468   :  { %1078 = vmatprep.subr.bf16.mxu0 %v2271_v41  ;;  %1814 = vmatprep.subr.bf16.mxu1 %v2815_v6 }
 0x46b   :  { %1079 = vmatpush1.bf16.msra.mxu0 %v2287_v44  ;;  %1815 = vmatpush3.bf16.msra.mxu1 %v2336_v51 }
 0x46c   :  { %1080 = vmatprep.subr.bf16.mxu0 %v2294_v45  ;;  %1816 = vmatprep.subr.bf16.mxu1 %v2815_v6 }
 0x46f   :  { %1081 = vmatpush1.bf16.msra.mxu0 %v2309_v47  ;;  %1817 = vmatpush3.bf16.msra.mxu1 %v2345_v52 }
 0x470   :  { %1082 = vmatprep.subr.bf16.mxu0 %v2315_v48  ;;  %1818 = vmatprep.subr.bf16.mxu1 %v2815_v6 }
 0x473   :  { %1083 = vmatpush1.bf16.msra.mxu0 %v2328_v50  ;;  %1819 = vmatpush3.bf16.msra.mxu1 %v2355_v54 }
 0x474   :  { %1172 = vmatprep.subr.bf16.mxu0 %v2185_v24  ;;  %1824 = vmatprep.subr.bf16.mxu1 %v2815_v6 }
 0x529   :  { %v998_v19 = vpop.f32.mrb[32].mxu0  ;;  %v1039_v59 = vpop.f32.mrb[24].mxu1 }
 0x52a   :  { %v1045_v15 = vadd.f32 %v998_v19, %v2418_v23  ;;  %v1000_v14 = vpop.f32.mrb[33].mxu0  ;;  %v1802_v53 = vpop.f32.mrb[25].mxu1  ;;  %v1059_v37 = vadd.f32 %v2449_v60, %v1039_v59  ;;  %v2049_v59 = vld [vmem:[%s2801_s2] ss:$12 sps:$4 sm:$0xff]  }
 0x52b   :  { %v1052_v62 = vadd.f32 %v1000_v14, %v2420_v28  ;;  %v1002_v34 = vpop.f32.mrb[34].mxu0  ;;  %v1042_v1 = vpop.f32.mrb[26].mxu1  ;;  %v2052_v14 = vld [vmem:[%s2801_s2 + $0x18] ss:$12 sps:$4 sm:$0xff]   ;;  %v2053_v53 = vld [vmem:[%s2801_s2 + $0x20] ss:$12 sps:$4 sm:$0xff]  }
 0x52c   :  { %v1570_v63 = vmul.f32 -1.442695, %v1045_v15  ;;  %v1003_v25 = vpop.f32.mrb[35].mxu0  ;;  %v1803_v55 = vpop.f32.mrb[27].mxu1  ;;  %v2051_v15 = vld [vmem:[%s2801_s2 + $0x1c] ss:$12 sps:$4 sm:$0xff]  }
 0x52d   :  { %v1571_v31 = vmul.f32 -1.442695, %v1052_v62  ;;  %v2054_v62 = vld [vmem:[%s2801_s2 + $0x34] ss:$12 sps:$4 sm:$0xff]   ;;  %v2056_v34 = vld [vmem:[%s2801_s2 + $0x38] ss:$12 sps:$4 sm:$0xff]  }
 0x52e   :  { %2004 = vpow2.f32 %v1570_v63  ;;  %v2057_v1 = vld [vmem:[%s2801_s2 + $0x4c] ss:$12 sps:$4 sm:$0xff]   ;;  %v2058_v63 = vld [vmem:[%s2801_s2 + $0x48] ss:$12 sps:$4 sm:$0xff]   ;;  %v2059_v25 = vld [vmem:[%s2801_s2 + $0x50] ss:$12 sps:$4 sm:$0xff]  }
 0x52f   :  { %2006 = vpow2.f32 %v1571_v31  ;;  %v2060_v55 = vld [vmem:[%s2801_s2 + $0x64] ss:$12 sps:$4 sm:$0xff]   ;;  %v2061_v31 = vld [vmem:[%s2801_s2 + $0x60] ss:$12 sps:$4 sm:$0xff]  }
 0x538   :  { %v2005_v18 = vpop.eup %2004 }
 0x539   :  { %v1049_v24 = vadd.f32 1.0, %v2005_v18  ;;  %v2007_v12 = vpop.eup %2006  ;;  %v2062_v18 = vld [vmem:[%s2801_s2 + $0x7c] ss:$12 sps:$4 sm:$0xff]  }
 0x53a   :  { %v1056_v2 = vadd.f32 1.0, %v2007_v12  ;;  %v2064_v12 = vld [vmem:[%s2801_s2 + $0x94] ss:$12 sps:$4 sm:$0xff]  }
 0x53b   :  { %2008 = vrcp.f32 %v1049_v24  ;;  %v2063_v24 = vld [vmem:[%s2801_s2 + $0x78] ss:$12 sps:$4 sm:$0xff]  }
 0x53c   :  { %2010 = vrcp.f32 %v1056_v2  ;;  %v2066_v2 = vld [vmem:[%s2801_s2 + $0xac] ss:$12 sps:$4 sm:$0xff]  }
 0x545   :  { %v2009_v23 = vpop.eup %2008 }
 0x546   :  { %v1060_v5 = vmul.f32 %v2009_v23, %v1059_v37  ;;  %v2011_v56 = vpop.eup %2010 }
 0x547   :  { %v1063_v8 = vsub.f32 1.0, %v2011_v56  ;;  %v1065_v17 = vmul.f32 %v2011_v56, %v2585_v21  ;;  %v2817_v56 = vld [vmem:[#allocation5_spill] sm:$0xff] }
 0x548   :  { %v1061_v28 = vadd.f32 %v1060_v5, %v2430_v58 }
 0x54a   :  { %2012 = vtanh.f32 %v1061_v28 }
 0x554   :  { %v2013_v13 = vpop.eup %2012 }
 0x555   :  { %v1064_v0 = vmul.f32 %v2013_v13, %v1063_v8 }
 0x557   :  { %v2629_v10 = vadd.f32 %v1065_v17, %v1064_v0 }
 0x559   :  { %v1067_v3 = vpack.c.bf16 %v2629_v10, %v2629_v10 }
 0x55b   :  { %1101 = vmatmul.mubr.bf16.vlgmr.msra.gmra.mrb[36].mxu0 %v1067_v3  ;;  %1821 = vmatmul.mubr.bf16.vlgmr.msra.gmra.mrb[28].mxu1 %v1067_v3 }
 0x55c   :  { %1173 = vmatpush1.bf16.msra.mxu0 %v2193_v26  ;;  %1825 = vmatpush3.bf16.msra.mxu1 %v2236_v35  ;;  %v2048_v26 = vld [vmem:[%s2801_s2 + $0x4] ss:$12 sps:$4 sm:$0xff]  }
 0x55d   :  { %1174 = vmatprep.subr.bf16.mxu0 %v2199_v27  ;;  %1826 = vmatprep.subr.bf16.mxu1 %v2815_v6 }
 0x55e   :  { %1204 = vmatprep.mubr.bf16.mxu0 %v2816_v16  ;;  %1840 = vmatprep.mubr.msk.bf16.mxu1 %vm2070_vm0, %v2815_v6 }
 0x560   :  { %1175 = vmatpush1.bf16.msra.mxu0 %v2208_v29  ;;  %1827 = vmatpush3.bf16.msra.mxu1 %v2258_v39 }
 0x561   :  { %1176 = vmatprep.subr.bf16.mxu0 %v2215_v30  ;;  %1828 = vmatprep.subr.bf16.mxu1 %v2815_v6 }
 0x564   :  { %1177 = vmatpush1.bf16.msra.mxu0 %v2224_v32  ;;  %1829 = vmatpush3.bf16.msra.mxu1 %v2277_v42 }
 0x565   :  { %1178 = vmatprep.subr.bf16.mxu0 %v2230_v33  ;;  %1830 = vmatprep.subr.bf16.mxu1 %v2815_v6 }
 0x568   :  { %1179 = vmatpush1.bf16.msra.mxu0 %v2242_v36  ;;  %1831 = vmatpush3.bf16.msra.mxu1 %v2300_v46 }
 0x569   :  { %1180 = vmatprep.subr.bf16.mxu0 %v2252_v38  ;;  %1832 = vmatprep.subr.bf16.mxu1 %v2815_v6 }
 0x56c   :  { %1181 = vmatpush1.bf16.msra.mxu0 %v2265_v40  ;;  %1833 = vmatpush3.bf16.msra.mxu1 %v2321_v49 }
 0x56d   :  { %1182 = vmatprep.subr.bf16.mxu0 %v2271_v41  ;;  %1834 = vmatprep.subr.bf16.mxu1 %v2815_v6 }
 0x570   :  { %1183 = vmatpush1.bf16.msra.mxu0 %v2287_v44  ;;  %1835 = vmatpush3.bf16.msra.mxu1 %v2336_v51 }
 0x571   :  { %1184 = vmatprep.subr.bf16.mxu0 %v2294_v45  ;;  %1836 = vmatprep.subr.bf16.mxu1 %v2815_v6 }
 0x574   :  { %1185 = vmatpush1.bf16.msra.mxu0 %v2309_v47  ;;  %1837 = vmatpush3.bf16.msra.mxu1 %v2345_v52 }
 0x575   :  { %1186 = vmatprep.subr.bf16.mxu0 %v2315_v48  ;;  %1838 = vmatprep.subr.bf16.mxu1 %v2815_v6 }
 0x578   :  { %1187 = vmatpush1.bf16.msra.mxu0 %v2328_v50  ;;  %1839 = vmatpush3.bf16.msra.mxu1 %v2355_v54 }
 0x579   :  { %1276 = vmatprep.subr.bf16.mxu0 %v2048_v26  ;;  %1844 = vmatprep.subr.bf16.mxu1 %v2815_v6 }
 0x62e   :  { %v1102_v27 = vpop.f32.mrb[36].mxu0  ;;  %v1143_v29 = vpop.f32.mrb[28].mxu1 }
 0x62f   :  { %v1149_v30 = vadd.f32 %v1102_v27, %v2422_v43  ;;  %v1104_v32 = vpop.f32.mrb[37].mxu0  ;;  %v1822_v33 = vpop.f32.mrb[29].mxu1  ;;  %v1163_v48 = vadd.f32 %v2449_v60, %v1143_v29 }
 0x630   :  { %v1156_v35 = vadd.f32 %v1104_v32, %v2427_v57  ;;  %v1106_v36 = vpop.f32.mrb[38].mxu0  ;;  %v1146_v38 = vpop.f32.mrb[30].mxu1 }
 0x631   :  { %v1572_v39 = vmul.f32 -1.442695, %v1149_v30  ;;  %v1107_v40 = vpop.f32.mrb[39].mxu0  ;;  %v1823_v41 = vpop.f32.mrb[31].mxu1 }
 0x632   :  { %v1573_v42 = vmul.f32 -1.442695, %v1156_v35  ;;  %v2818_v35 = vld [vmem:[#allocation3_spill] sm:$0xff] }
 0x633   :  { %2014 = vpow2.f32 %v1572_v39 }
 0x634   :  { %2016 = vpow2.f32 %v1573_v42 }
 0x63d   :  { %v2015_v44 = vpop.eup %2014 }
 0x63e   :  { %v1153_v45 = vadd.f32 1.0, %v2015_v44  ;;  %v2017_v46 = vpop.eup %2016 }
 0x63f   :  { %v1160_v47 = vadd.f32 1.0, %v2017_v46  ;;  %v1956_v46 = vld [vmem:[%s2804_s5] sm:$0xff]  }
 0x640   :  { %2018 = vrcp.f32 %v1153_v45 }
 0x641   :  { %2020 = vrcp.f32 %v1160_v47  ;;  %v1957_v47 = vld [vmem:[%s2804_s5 + $0x8] sm:$0xff]  }
 0x64a   :  { %v2019_v50 = vpop.eup %2018 }
 0x64b   :  { %v1164_v43 = vmul.f32 %v2019_v50, %v1163_v48  ;;  %v2021_v58 = vpop.eup %2020  ;;  %v1958_v48 = vld [vmem:[%s2804_s5 + $0x10] sm:$0xff]   ;;  %v1959_v50 = vld [vmem:[%s2804_s5 + $0x18] sm:$0xff]  }
 0x64c   :  { %v1167_v7 = vsub.f32 1.0, %v2021_v58  ;;  %v1169_v21 = vmul.f32 %v2021_v58, %v2629_v10  ;;  %v1962_v58 = vld [vmem:[%s2804_s5 + $0x30] sm:$0xff]  }
 0x64d   :  { %v1165_v57 = vadd.f32 %v1164_v43, %v2436_v4  ;;  %v2050_v4 = vld [vmem:[%s2801_s2 + $0x8] ss:$12 sps:$4 sm:$0xff]   ;;  %v1960_v43 = vld [vmem:[%s2804_s5 + $0x20] sm:$0xff]  }
 0x64f   :  { %2022 = vtanh.f32 %v1165_v57  ;;  %v1961_v57 = vld [vmem:[%s2804_s5 + $0x28] sm:$0xff]  }
 0x659   :  { %v2023_v11 = vpop.eup %2022 }
 0x65a   :  { %v1168_v20 = vmul.f32 %v2023_v11, %v1167_v7  ;;  %v1963_v7 = vld [vmem:[%s2804_s5 + $0x38] sm:$0xff]  }
 0x65c   :  { %v2675_v61 = vadd.f32 %v1169_v21, %v1168_v20  ;;  %v2819_v21 = vld [vmem:[#allocation6_spill] sm:$0xff] }
 0x65e   :  { %v1171_v19 = vpack.c.bf16 %v2675_v61, %v2675_v61 }
 0x660   :  { %1205 = vmatmul.mubr.bf16.vlgmr.msra.gmra.mrb[40].mxu0 %v1171_v19  ;;  %1841 = vmatmul.mubr.bf16.vlgmr.msra.gmra.mrb[32].mxu1 %v1171_v19 }
 0x661   :  { %1277 = vmatpush1.bf16.msra.mxu0 %v2049_v59  ;;  %1845 = vmatpush3.bf16.msra.mxu1 %v2050_v4 }
 0x662   :  { %1278 = vmatprep.subr.bf16.mxu0 %v2051_v15  ;;  %1846 = vmatprep.subr.bf16.mxu1 %v2815_v6 }
 0x663   :  { %1308 = vmatprep.mubr.bf16.mxu0 %v2816_v16  ;;  %1860 = vmatprep.mubr.msk.bf16.mxu1 %vm2070_vm0, %v2815_v6  ;;  %v2055_v16 = vld [vmem:[%s2801_s2 + $0x30] ss:$12 sps:$4 sm:$0xff]  }
 0x665   :  { %1279 = vmatpush1.bf16.msra.mxu0 %v2052_v14  ;;  %1847 = vmatpush3.bf16.msra.mxu1 %v2053_v53 }
 0x666   :  { %1280 = vmatprep.subr.bf16.mxu0 %v2054_v62  ;;  %1848 = vmatprep.subr.bf16.mxu1 %v2815_v6 }
 0x669   :  { %1281 = vmatpush1.bf16.msra.mxu0 %v2055_v16  ;;  %1849 = vmatpush3.bf16.msra.mxu1 %v2056_v34 }
 0x66a   :  { %1282 = vmatprep.subr.bf16.mxu0 %v2057_v1  ;;  %1850 = vmatprep.subr.bf16.mxu1 %v2815_v6 }
 0x66d   :  { %1283 = vmatpush1.bf16.msra.mxu0 %v2058_v63  ;;  %1851 = vmatpush3.bf16.msra.mxu1 %v2059_v25 }
 0x66e   :  { %1284 = vmatprep.subr.bf16.mxu0 %v2060_v55  ;;  %1852 = vmatprep.subr.bf16.mxu1 %v2815_v6 }
 0x671   :  { %1285 = vmatpush1.bf16.msra.mxu0 %v2061_v31  ;;  %1853 = vmatpush3.bf16.msra.mxu1 %v2321_v49  ;;  %v2065_v49 = vld [vmem:[%s2801_s2 + $0x90] ss:$12 sps:$4 sm:$0xff]  }
 0x672   :  { %1286 = vmatprep.subr.bf16.mxu0 %v2062_v18  ;;  %1854 = vmatprep.subr.bf16.mxu1 %v2815_v6 }
 0x675   :  { %1287 = vmatpush1.bf16.msra.mxu0 %v2063_v24  ;;  %1855 = vmatpush3.bf16.msra.mxu1 %v2336_v51  ;;  %v2067_v51 = vld [vmem:[%s2801_s2 + $0xa8] ss:$12 sps:$4 sm:$0xff]  }
 0x676   :  { %1288 = vmatprep.subr.bf16.mxu0 %v2064_v12  ;;  %1856 = vmatprep.subr.bf16.mxu1 %v2815_v6  ;;  %v2820_v24 = vld [vmem:[#allocation4_spill] sm:$0xff] }
 0x679   :  { %1289 = vmatpush1.bf16.msra.mxu0 %v2065_v49  ;;  %1857 = vmatpush3.bf16.msra.mxu1 %v2345_v52 }
 0x67a   :  { %1290 = vmatprep.subr.bf16.mxu0 %v2066_v2  ;;  %1858 = vmatprep.subr.bf16.mxu1 %v2815_v6 }
 0x67d   :  { %1291 = vmatpush1.bf16.msra.mxu0 %v2067_v51  ;;  %1859 = vmatpush3.bf16.msra.mxu1 %v2355_v54 }
 0x67e   :  { %1864 = vmatprep.subr.bf16.mxu0 %v2815_v6 }
 0x733   :  { %v1206_v37 = vpop.f32.mrb[40].mxu0  ;;  %v1247_v23 = vpop.f32.mrb[32].mxu1 }
 0x734   :  { %v1253_v52 = vadd.f32 %v1206_v37, %v2438_v9  ;;  %v1208_v5 = vpop.f32.mrb[41].mxu0  ;;  %v1842_v28 = vpop.f32.mrb[33].mxu1  ;;  %v1267_v32 = vadd.f32 %v2449_v60, %v1247_v23 }
 0x735   :  { %v1260_v8 = vadd.f32 %v1208_v5, %v2817_v56  ;;  %v1210_v13 = vpop.f32.mrb[42].mxu0  ;;  %v1250_v0 = vpop.f32.mrb[34].mxu1  ;;  %v1578_v5 = vld [vmem:[%s2805_s6] ss:$0 sm:$0xff] }
 0x736   :  { %v1574_v17 = vmul.f32 -1.442695, %v1253_v52  ;;  %v1211_v10 = vpop.f32.mrb[43].mxu0  ;;  %v1843_v3 = vpop.f32.mrb[35].mxu1 }
 0x737   :  { %v1575_v26 = vmul.f32 -1.442695, %v1260_v8 }
 0x738   :  { %2024 = vpow2.f32 %v1574_v17 }
 0x739   :  { %2026 = vpow2.f32 %v1575_v26 }
 0x742   :  { %v2025_v27 = vpop.eup %2024 }
 0x743   :  { %v1257_v54 = vadd.f32 1.0, %v2025_v27  ;;  %v2027_v29 = vpop.eup %2026 }
 0x744   :  { %v1264_v30 = vadd.f32 1.0, %v2027_v29 }
 0x745   :  { %2028 = vrcp.f32 %v1257_v54 }
 0x746   :  { %2030 = vrcp.f32 %v1264_v30 }
 0x74f   :  { %v2029_v9 = vpop.eup %2028 }
 0x750   :  { %v1268_v33 = vmul.f32 %v2029_v9, %v1267_v32  ;;  %v2031_v38 = vpop.eup %2030 }
 0x751   :  { %v1271_v39 = vsub.f32 1.0, %v2031_v38  ;;  %v1273_v42 = vmul.f32 %v2031_v38, %v2675_v61 }
 0x752   :  { %v1269_v36 = vadd.f32 %v1268_v33, %v2818_v35 }
 0x754   :  { %2032 = vtanh.f32 %v1269_v36 }
 0x75e   :  { %v2033_v40 = vpop.eup %2032 }
 0x75f   :  { %v1272_v41 = vmul.f32 %v2033_v40, %v1271_v39 }
 0x761   :  { %v1274_v44 = vadd.f32 %v1273_v42, %v1272_v41 }
 0x763   :  { %v1275_v45 = vpack.c.bf16 %v1274_v44, %v1274_v44 }
 0x765   :  { %1309 = vmatmul.mubr.bf16.vlgmr.msra.gmra.mrb[44].mxu0 %v1275_v45  ;;  %1861 = vmatmul.mubr.bf16.vlgmr.msra.gmra.mrb[36].mxu1 %v1275_v45 }
 0x766   :  { %1880 = vmatprep.mubr.msk.bf16.mxu0 %vm2070_vm0, %v2815_v6  ;;  %1865 = vmatpush3.bf16.msra.mxu0 %v1956_v46 }
 0x767   :  { %1866 = vmatprep.subr.bf16.mxu0 %v2815_v6 }
 0x76a   :  { %1867 = vmatpush3.bf16.msra.mxu0 %v1957_v47 }
 0x76b   :  { %1868 = vmatprep.subr.bf16.mxu0 %v2815_v6 }
 0x76e   :  { %1869 = vmatpush3.bf16.msra.mxu0 %v1958_v48 }
 0x76f   :  { %1870 = vmatprep.subr.bf16.mxu0 %v2815_v6 }
 0x772   :  { %1871 = vmatpush3.bf16.msra.mxu0 %v1959_v50 }
 0x773   :  { %1872 = vmatprep.subr.bf16.mxu0 %v2815_v6 }
 0x776   :  { %1873 = vmatpush3.bf16.msra.mxu0 %v1960_v43 }
 0x777   :  { %1874 = vmatprep.subr.bf16.mxu0 %v2815_v6 }
 0x77a   :  { %1875 = vmatpush3.bf16.msra.mxu0 %v1961_v57 }
 0x77b   :  { %1876 = vmatprep.subr.bf16.mxu0 %v2815_v6 }
 0x77e   :  { %1877 = vmatpush3.bf16.msra.mxu0 %v1962_v58 }
 0x77f   :  { %1878 = vmatprep.subr.bf16.mxu0 %v2815_v6 }
 0x782   :  { %1879 = vmatpush3.bf16.msra.mxu0 %v1963_v7 }
 0x838   :  { %v1310_v11 = vpop.f32.mrb[44].mxu0  ;;  %v1351_v20 = vpop.f32.mrb[36].mxu1 }
 0x839   :  { %v1357_v61 = vadd.f32 %v1310_v11, %v2819_v21  ;;  %v1312_v19 = vpop.f32.mrb[45].mxu0  ;;  %v1862_v59 = vpop.f32.mrb[37].mxu1  ;;  %v1371_v55 = vadd.f32 %v2449_v60, %v1351_v20 }
 0x83a   :  { %v1364_v4 = vadd.f32 %v1312_v19, %v2444_v22  ;;  %v1314_v15 = vpop.f32.mrb[46].mxu0  ;;  %v1354_v14 = vpop.f32.mrb[38].mxu1 }
 0x83b   :  { %v1576_v53 = vmul.f32 -1.442695, %v1357_v61  ;;  %v1315_v62 = vpop.f32.mrb[47].mxu0  ;;  %v1863_v16 = vpop.f32.mrb[39].mxu1 }
 0x83c   :  { %v1577_v34 = vmul.f32 -1.442695, %v1364_v4 }
 0x83d   :  { %2034 = vpow2.f32 %v1576_v53 }
 0x83e   :  { %2036 = vpow2.f32 %v1577_v34 }
 0x847   :  { %v2035_v1 = vpop.eup %2034 }
 0x848   :  { %v1361_v63 = vadd.f32 1.0, %v2035_v1  ;;  %v2037_v6 = vpop.eup %2036 }
 0x849   :  { %v1368_v25 = vadd.f32 1.0, %v2037_v6 }
 0x84a   :  { %2038 = vrcp.f32 %v1361_v63 }
 0x84b   :  { %2040 = vrcp.f32 %v1368_v25 }
 0x854   :  { %v2039_v31 = vpop.eup %2038 }
 0x855   :  { %v1372_v18 = vmul.f32 %v2039_v31, %v1371_v55  ;;  %v2041_v12 = vpop.eup %2040 }
 0x856   :  { %v1375_v49 = vsub.f32 1.0, %v2041_v12  ;;  %v1377_v37 = vmul.f32 %v2041_v12, %v1274_v44 }
 0x857   :  { %v1373_v22 = vadd.f32 %v1372_v18, %v2820_v24 }
 0x859   :  { %2042 = vtanh.f32 %v1373_v22 }
 0x863   :  { %v2043_v2 = vpop.eup %2042 }
 0x864   :  { %v1376_v51 = vmul.f32 %v2043_v2, %v1375_v49 }
 0x866   :  { %v1378_v23 = vadd.f32 %v1377_v37, %v1376_v51 }
 0x868   :  { %v1383_v52 = vpack.c.bf16 %v1378_v23, %v1378_v23 }
 0x86a   :  { %1881 = vmatmul.mubr.bf16.vlgmr.msra.gmra.mrb[48].mxu0 %v1383_v52 }
 0x93d   :  { %v1489_v28 = vpop.f32.mrb[48].mxu0 }
 0x93e   :  { %v1490_v60 = vadd.f32 %v1578_v5, %v1489_v28  ;;  %v1882_v56 = vpop.f32.mrb[49].mxu0 }
 0x93f   :  { %v1492_v8 = vpop.f32.mrb[50].mxu0 }
 0x940   :  { %1495 = vmax.xlane.f32.xlu0 %v1490_v60  ;;  %v1883_v13 = vpop.f32.mrb[51].mxu0 }
 0x9cd   :  { %v1496_v0 = vpop.xlane.xlu0 %1495 }
 0x9ce   :  { %v1497_v17 = vsub.f32 %v1490_v60, %v1496_v0 }
 0x9d0   :  { %v1498_v10 = vmul.f32 1.442695, %v1497_v17 }
 0x9d2   :  { %2044 = vpow2.f32 %v1498_v10 }
 0x9dc   :  { %v2045_v3 = vpop.eup %2044 }
 0x9dd   :  { %1500 = vadd.xlane.f32.xlu0 %v2045_v3 }
 0xa6a   :  { %v1501_v26 = vpop.xlane.xlu0 %1500 }
 0xa6b   :  { %2046 = vrcp.f32 %v1501_v26 }
 0xa75   :  { %v2047_v27 = vpop.eup %2046 }
 0xa76   :  { %v1503_v54 = vmul.f32 %v2047_v27, %v2045_v3 }
 0xa78   :  { %1504 = vst [vmem:[%s2806_s7] sm:$0xff] %v1503_v54 }

</bundles_post_ra>
